<compile_context>
chip_gen: v7x
topology: tpu7x:2x2x1
jax: 0.10.0
libtpu: 0.0.40
codegen_flags: <defaults>
</compile_context>

<pallas_src>
from math import sqrt

import jax
import jax.numpy as jnp
from jax.experimental import pallas as pl
from jax.experimental.pallas import tpu as pltpu


# ----------------------------- fused Pallas kernel ---------------------------


def _make_fused_lstm_kernel(*, num_layers, bb, T, H, O):
    """Fused [LSTM x num_layers -> Linear] kernel over a batch block of bb sequences.

    Kernel ref order:
      x_ref : (bb, T, Din)  VMEM
      for each layer l: w_ih_ref (Din_l, 4H), w_hh_ref (H, 4H), bias_ref (1, 4H)
                        (PyTorch gate order i, f, g, o)
      w_fc_ref : (H, O), b_fc_ref : (1, O)
      out_ref  : (bb, T, O)
    """

    def kernel(*args):
        x_ref = args[0]
        layer_refs = args[1:1 + 3 * num_layers]
        w_fc_ref = args[1 + 3 * num_layers]
        b_fc_ref = args[2 + 3 * num_layers]
        out_ref = args[3 + 3 * num_layers]

        Din = x_ref.shape[-1]

        # Load weights once (small: a couple dozen vregs total).
        w_ih = [layer_refs[3 * l][...] for l in range(num_layers)]       # (Din_l, 4H)
        w_hh = [layer_refs[3 * l + 1][...] for l in range(num_layers)]   # (H, 4H)
        bias = [layer_refs[3 * l + 2][...] for l in range(num_layers)]   # (1, 4H)
        w_fc = w_fc_ref[...]                                             # (H, O)
        b_fc = b_fc_ref[...]                                             # (1, O)

        # Layer-0 input projection hoisted out of the recurrence:
        # ONE MXU matmul for all bb*T rows.
        x = x_ref[...].reshape(bb * T, Din)
        pre0 = (
            jnp.dot(x, w_ih[0], preferred_element_type=jnp.float32) + bias[0]
        ).reshape(bb, T, 4 * H)                                          # (bb, T, 4H)

        # Recurrent state carried as values (vregs) — no VMEM scratch, no masked stores.
        h = [jnp.zeros((bb, H), jnp.float32) for _ in range(num_layers)]
        c = [jnp.zeros((bb, H), jnp.float32) for _ in range(num_layers)]

        outs = []
        # Wavefront: time outer, layer inner. Fully unrolled so the scheduler sees the
        # pure data-dependence chain and overlaps layer l step t with layer l-1 step t+1.
        for t in range(T):
            inp = None
            for l in range(num_layers):
                if l == 0:
                    g = pre0[:, t, :]                                    # (bb, 4H)
                else:
                    g = jnp.dot(inp, w_ih[l], preferred_element_type=jnp.float32) + bias[l]
                g = g + jnp.dot(h[l], w_hh[l], preferred_element_type=jnp.float32)
                s = jax.nn.sigmoid(g)                 # full-width: i, f, o lanes used
                u = jnp.tanh(g[:, 2 * H:3 * H])       # narrowed to the g-gate slice
                c[l] = s[:, H:2 * H] * c[l] + s[:, 0:H] * u
                h[l] = s[:, 3 * H:4 * H] * jnp.tanh(c[l])
                inp = h[l]
            outs.append(h[num_layers - 1])                               # (bb, H)

        # FC epilogue: one matmul over the whole (bb*T, H) hidden sequence, one store.
        seq = jnp.stack(outs, axis=1).reshape(bb * T, H)                 # stays in vregs
        out = jnp.dot(seq, w_fc, preferred_element_type=jnp.float32) + b_fc
        out_ref[...] = out.reshape(bb, T, O).astype(out_ref.dtype)

    return kernel


# ------------------------------ forward wrapper -------------------------------


def lstm_model_forward(x, params, *, num_batch_blocks=1):
    """Forward pass of LSTMModel (eval mode, unidirectional).

    x: (B, T, input_dim) batch-first, like PyTorch nn.LSTM(batch_first=True).
    Returns (B, T, output_dim).
    num_batch_blocks=1 is best at these sizes (latency-bound; a 2-TC split would only
    duplicate weight DMAs). Re-benchmark 2 on v7x if B / T / H grow substantially.
    """
    B, T, Din = x.shape
    H = params["lstm"][0]["w_hh_t"].shape[0]
    O = params["fc_w_t"].shape[1]
    L = len(params["lstm"])

    assert B % num_batch_blocks == 0
    bb = B // num_batch_blocks

    kernel = _make_fused_lstm_kernel(num_layers=L, bb=bb, T=T, H=H, O=O)

    in_specs = [pl.BlockSpec((bb, T, Din), lambda i: (i, 0, 0))]
    args = [x]
    for layer in params["lstm"]:
        d_in = layer["w_ih_t"].shape[0]
        # Constant index_maps -> weights fetched once and kept resident across grid steps.
        in_specs += [
            pl.BlockSpec((d_in, 4 * H), lambda i: (0, 0)),
            pl.BlockSpec((H, 4 * H), lambda i: (0, 0)),
            pl.BlockSpec((1, 4 * H), lambda i: (0, 0)),
        ]
        args += [layer["w_ih_t"], layer["w_hh_t"], layer["bias"]]
    in_specs += [
        pl.BlockSpec((H, O), lambda i: (0, 0)),
        pl.BlockSpec((1, O), lambda i: (0, 0)),
    ]
    args += [params["fc_w_t"], params["fc_b"]]

    return pl.pallas_call(
        kernel,
        out_shape=jax.ShapeDtypeStruct((B, T, O), jnp.float32),
        grid=(num_batch_blocks,),
        in_specs=in_specs,
        out_specs=pl.BlockSpec((bb, T, O), lambda i: (i, 0, 0)),
        compiler_params=pltpu.CompilerParams(
            dimension_semantics=("parallel",),
        ),
    )(*args)


# ----------------------------- param init ------------------------------------


def init_params(key, input_dim, hidden_dim, layer_dim, output_dim):
    """PyTorch-style U(-1/sqrt(H), 1/sqrt(H)) init.

    Weights are stored PRE-TRANSPOSED and biases PRE-SUMMED once here, so the forward
    path does zero per-call layout work.
    """
    k = 1.0 / sqrt(hidden_dim)
    params = {"lstm": []}
    for l in range(layer_dim):
        din = input_dim if l == 0 else hidden_dim
        key, k1, k2, k3, k4 = jax.random.split(key, 5)
        w_ih = jax.random.uniform(k1, (4 * hidden_dim, din), jnp.float32, -k, k)
        w_hh = jax.random.uniform(k2, (4 * hidden_dim, hidden_dim), jnp.float32, -k, k)
        b_ih = jax.random.uniform(k3, (4 * hidden_dim,), jnp.float32, -k, k)
        b_hh = jax.random.uniform(k4, (4 * hidden_dim,), jnp.float32, -k, k)
        params["lstm"].append(
            {
                "w_ih_t": jnp.transpose(w_ih),                       # (Din, 4H)
                "w_hh_t": jnp.transpose(w_hh),                       # (H, 4H)
                "bias": (b_ih + b_hh).reshape(1, 4 * hidden_dim),    # (1, 4H)
            }
        )
    key, k5, k6 = jax.random.split(key, 3)
    fc_w = jax.random.uniform(k5, (output_dim, hidden_dim), jnp.float32, -k, k)
    fc_b = jax.random.uniform(k6, (output_dim,), jnp.float32, -k, k)
    params["fc_w_t"] = jnp.transpose(fc_w)                           # (H, O)
    params["fc_b"] = fc_b.reshape(1, output_dim)                     # (1, O)
    return params


# ----------------------------- pure-JAX reference -----------------------------


def reference_forward(x, params):
    B, T, _ = x.shape
    seq = x                                                    # (B, T, Din)
    for layer in params["lstm"]:
        H = layer["w_hh_t"].shape[0]
        h = jnp.zeros((B, H), jnp.float32)
        c = jnp.zeros((B, H), jnp.float32)
        outs = []
        for t in range(T):
            gates = seq[:, t, :] @ layer["w_ih_t"] + h @ layer["w_hh_t"] + layer["bias"]
            i = jax.nn.sigmoid(gates[:, 0:H])
            f = jax.nn.sigmoid(gates[:, H:2 * H])
            g = jnp.tanh(gates[:, 2 * H:3 * H])
            o = jax.nn.sigmoid(gates[:, 3 * H:4 * H])
            c = f * c + i * g
            h = o * jnp.tanh(c)
            outs.append(h)
        seq = jnp.stack(outs, axis=1)                          # (B, T, H)
    return seq @ params["fc_w_t"] + params["fc_b"]             # (B, T, O)


# ---------------------------------- main --------------------------------------


if __name__ == "__main__":
    # LSTMModel(input_dim=16, hidden_dim=32, layer_dim=2, output_dim=4,
    #           dropout_prob=0.0, is_bidirectional=False)
    B, T = 2, 8
    input_dim, hidden_dim, layer_dim, output_dim = 16, 32, 2, 4

    key = jax.random.PRNGKey(0)
    key, kx, kp = jax.random.split(key, 3)
    x = jax.random.normal(kx, (B, T, input_dim), jnp.float32)
    params = init_params(kp, input_dim, hidden_dim, layer_dim, output_dim)

    fwd = jax.jit(lstm_model_forward)
    out = fwd(x, params)
    out = jax.block_until_ready(out)

    ref = reference_forward(x, params)
    assert out.shape == (B, T, output_dim), out.shape
    assert jnp.allclose(out, ref, rtol=1e-5, atol=1e-5), float(jnp.max(jnp.abs(out - ref)))

    print("KERNEL_OK")
</pallas_src>

<mosaic_0001>
module attributes {stable_mosaic.version = 11 : i64} {
  func.func @kernel(%arg0: i32, %arg1: memref<2x8x16xf32, #tpu.memory_space<vmem>>, %arg2: memref<16x128xf32, #tpu.memory_space<vmem>>, %arg3: memref<32x128xf32, #tpu.memory_space<vmem>>, %arg4: memref<1x128xf32, #tpu.memory_space<vmem>>, %arg5: memref<32x128xf32, #tpu.memory_space<vmem>>, %arg6: memref<32x128xf32, #tpu.memory_space<vmem>>, %arg7: memref<1x128xf32, #tpu.memory_space<vmem>>, %arg8: memref<32x4xf32, #tpu.memory_space<vmem>>, %arg9: memref<1x4xf32, #tpu.memory_space<vmem>>, %arg10: memref<2x8x4xf32, #tpu.memory_space<vmem>>) attributes {dimension_semantics = [#tpu.dimension_semantics<parallel>], iteration_bounds = array<i64: 1>, scalar_prefetch = 0 : i64, scratch_operands = 0 : i64, tpu.core_type = #tpu.core_type<tc>, window_params = [{transform_indices = @transform_0, window_bounds = array<i64: 2, 8, 16>}, {pipeline_mode = #tpu.pipeline_mode<synchronous>, transform_indices = @transform_1, window_bounds = array<i64: 16, 128>}, {pipeline_mode = #tpu.pipeline_mode<synchronous>, transform_indices = @transform_2, window_bounds = array<i64: 32, 128>}, {pipeline_mode = #tpu.pipeline_mode<synchronous>, transform_indices = @transform_3, window_bounds = array<i64: 1, 128>}, {pipeline_mode = #tpu.pipeline_mode<synchronous>, transform_indices = @transform_4, window_bounds = array<i64: 32, 128>}, {pipeline_mode = #tpu.pipeline_mode<synchronous>, transform_indices = @transform_5, window_bounds = array<i64: 32, 128>}, {pipeline_mode = #tpu.pipeline_mode<synchronous>, transform_indices = @transform_6, window_bounds = array<i64: 1, 128>}, {pipeline_mode = #tpu.pipeline_mode<synchronous>, transform_indices = @transform_7, window_bounds = array<i64: 32, 4>}, {pipeline_mode = #tpu.pipeline_mode<synchronous>, transform_indices = @transform_8, window_bounds = array<i64: 1, 4>}, {transform_indices = @transform_9, window_bounds = array<i64: 2, 8, 4>}]} {
    %c0 = arith.constant 0 : index
    %c0_0 = arith.constant 0 : index
    %0 = vector.load %arg2[%c0, %c0_0] : memref<16x128xf32, #tpu.memory_space<vmem>>, vector<16x128xf32>
    %c0_1 = arith.constant 0 : index
    %c0_2 = arith.constant 0 : index
    %1 = vector.load %arg5[%c0_1, %c0_2] : memref<32x128xf32, #tpu.memory_space<vmem>>, vector<32x128xf32>
    %c0_3 = arith.constant 0 : index
    %c0_4 = arith.constant 0 : index
    %2 = vector.load %arg3[%c0_3, %c0_4] : memref<32x128xf32, #tpu.memory_space<vmem>>, vector<32x128xf32>
    %c0_5 = arith.constant 0 : index
    %c0_6 = arith.constant 0 : index
    %3 = vector.load %arg6[%c0_5, %c0_6] : memref<32x128xf32, #tpu.memory_space<vmem>>, vector<32x128xf32>
    %c0_7 = arith.constant 0 : index
    %c0_8 = arith.constant 0 : index
    %4 = vector.load %arg4[%c0_7, %c0_8] : memref<1x128xf32, #tpu.memory_space<vmem>>, vector<1x128xf32>
    %c0_9 = arith.constant 0 : index
    %c0_10 = arith.constant 0 : index
    %5 = vector.load %arg7[%c0_9, %c0_10] : memref<1x128xf32, #tpu.memory_space<vmem>>, vector<1x128xf32>
    %c0_11 = arith.constant 0 : index
    %c0_12 = arith.constant 0 : index
    %6 = vector.load %arg8[%c0_11, %c0_12] : memref<32x4xf32, #tpu.memory_space<vmem>>, vector<32x4xf32>
    %c0_13 = arith.constant 0 : index
    %c0_14 = arith.constant 0 : index
    %7 = vector.load %arg9[%c0_13, %c0_14] : memref<1x4xf32, #tpu.memory_space<vmem>>, vector<1x4xf32>
    %c0_15 = arith.constant 0 : index
    %c0_16 = arith.constant 0 : index
    %c0_17 = arith.constant 0 : index
    %8 = vector.load %arg1[%c0_15, %c0_16, %c0_17] : memref<2x8x16xf32, #tpu.memory_space<vmem>>, vector<2x8x16xf32>
    %9 = vector.shape_cast %8 : vector<2x8x16xf32> to vector<16x16xf32>
    %cst = arith.constant dense<0.000000e+00> : vector<16x128xf32>
    %10 = tpu.matmul %9, %0, %cst {dimension_numbers = #tpu.dot_dimension_numbers<[1], [0], [0], [1], [0, 0, 1, 1], [], []>} : vector<16x16xf32>, vector<16x128xf32>, vector<16x128xf32> -> vector<16x128xf32>
    %11 = vector.broadcast %4 : vector<1x128xf32> to vector<16x128xf32>
    %12 = arith.addf %10, %11 : vector<16x128xf32>
    %13 = vector.shape_cast %12 : vector<16x128xf32> to vector<2x8x128xf32>
    %cst_18 = arith.constant 0.000000e+00 : f32
    %14 = vector.broadcast %cst_18 : f32 to vector<2x32xf32>
    %cst_19 = arith.constant 0.000000e+00 : f32
    %15 = vector.broadcast %cst_19 : f32 to vector<2x32xf32>
    %cst_20 = arith.constant 0.000000e+00 : f32
    %16 = vector.broadcast %cst_20 : f32 to vector<2x32xf32>
    %cst_21 = arith.constant 0.000000e+00 : f32
    %17 = vector.broadcast %cst_21 : f32 to vector<2x32xf32>
    %18 = vector.extract_strided_slice %13 {offsets = [0, 0, 0], sizes = [2, 1, 128], strides = [1, 1, 1]} : vector<2x8x128xf32> to vector<2x1x128xf32>
    %19 = vector.shape_cast %18 : vector<2x1x128xf32> to vector<2x128xf32>
    %cst_22 = arith.constant dense<0.000000e+00> : vector<2x128xf32>
    %20 = tpu.matmul %14, %2, %cst_22 {dimension_numbers = #tpu.dot_dimension_numbers<[1], [0], [0], [1], [0, 0, 1, 1], [], []>} : vector<2x32xf32>, vector<32x128xf32>, vector<2x128xf32> -> vector<2x128xf32>
    %21 = arith.addf %19, %20 : vector<2x128xf32>
    %22 = arith.negf %21 : vector<2x128xf32>
    %23 = math.exp %22 : vector<2x128xf32>
    %cst_23 = arith.constant 1.000000e+00 : f32
    %24 = vector.broadcast %cst_23 : f32 to vector<2x128xf32>
    %25 = arith.addf %24, %23 : vector<2x128xf32>
    %26 = arith.divf %24, %25 : vector<2x128xf32>
    %27 = vector.extract_strided_slice %21 {offsets = [0, 64], sizes = [2, 32], strides = [1, 1]} : vector<2x128xf32> to vector<2x32xf32>
    %28 = math.tanh %27 : vector<2x32xf32>
    %29 = vector.extract_strided_slice %26 {offsets = [0, 32], sizes = [2, 32], strides = [1, 1]} : vector<2x128xf32> to vector<2x32xf32>
    %30 = arith.mulf %29, %16 : vector<2x32xf32>
    %31 = vector.extract_strided_slice %26 {offsets = [0, 0], sizes = [2, 32], strides = [1, 1]} : vector<2x128xf32> to vector<2x32xf32>
    %32 = arith.mulf %31, %28 : vector<2x32xf32>
    %33 = arith.addf %30, %32 : vector<2x32xf32>
    %34 = vector.extract_strided_slice %26 {offsets = [0, 96], sizes = [2, 32], strides = [1, 1]} : vector<2x128xf32> to vector<2x32xf32>
    %35 = math.tanh %33 : vector<2x32xf32>
    %36 = arith.mulf %34, %35 : vector<2x32xf32>
    %cst_24 = arith.constant dense<0.000000e+00> : vector<2x128xf32>
    %37 = tpu.matmul %36, %1, %cst_24 {dimension_numbers = #tpu.dot_dimension_numbers<[1], [0], [0], [1], [0, 0, 1, 1], [], []>} : vector<2x32xf32>, vector<32x128xf32>, vector<2x128xf32> -> vector<2x128xf32>
    %38 = vector.broadcast %5 : vector<1x128xf32> to vector<2x128xf32>
    %39 = arith.addf %37, %38 : vector<2x128xf32>
    %cst_25 = arith.constant dense<0.000000e+00> : vector<2x128xf32>
    %40 = tpu.matmul %15, %3, %cst_25 {dimension_numbers = #tpu.dot_dimension_numbers<[1], [0], [0], [1], [0, 0, 1, 1], [], []>} : vector<2x32xf32>, vector<32x128xf32>, vector<2x128xf32> -> vector<2x128xf32>
    %41 = arith.addf %39, %40 : vector<2x128xf32>
    %42 = arith.negf %41 : vector<2x128xf32>
    %43 = math.exp %42 : vector<2x128xf32>
    %cst_26 = arith.constant 1.000000e+00 : f32
    %44 = vector.broadcast %cst_26 : f32 to vector<2x128xf32>
    %45 = arith.addf %44, %43 : vector<2x128xf32>
    %46 = arith.divf %44, %45 : vector<2x128xf32>
    %47 = vector.extract_strided_slice %41 {offsets = [0, 64], sizes = [2, 32], strides = [1, 1]} : vector<2x128xf32> to vector<2x32xf32>
    %48 = math.tanh %47 : vector<2x32xf32>
    %49 = vector.extract_strided_slice %46 {offsets = [0, 32], sizes = [2, 32], strides = [1, 1]} : vector<2x128xf32> to vector<2x32xf32>
    %50 = arith.mulf %49, %17 : vector<2x32xf32>
    %51 = vector.extract_strided_slice %46 {offsets = [0, 0], sizes = [2, 32], strides = [1, 1]} : vector<2x128xf32> to vector<2x32xf32>
    %52 = arith.mulf %51, %48 : vector<2x32xf32>
    %53 = arith.addf %50, %52 : vector<2x32xf32>
    %54 = vector.extract_strided_slice %46 {offsets = [0, 96], sizes = [2, 32], strides = [1, 1]} : vector<2x128xf32> to vector<2x32xf32>
    %55 = math.tanh %53 : vector<2x32xf32>
    %56 = arith.mulf %54, %55 : vector<2x32xf32>
    %57 = vector.extract_strided_slice %13 {offsets = [0, 1, 0], sizes = [2, 1, 128], strides = [1, 1, 1]} : vector<2x8x128xf32> to vector<2x1x128xf32>
    %58 = vector.shape_cast %57 : vector<2x1x128xf32> to vector<2x128xf32>
    %cst_27 = arith.constant dense<0.000000e+00> : vector<2x128xf32>
    %59 = tpu.matmul %36, %2, %cst_27 {dimension_numbers = #tpu.dot_dimension_numbers<[1], [0], [0], [1], [0, 0, 1, 1], [], []>} : vector<2x32xf32>, vector<32x128xf32>, vector<2x128xf32> -> vector<2x128xf32>
    %60 = arith.addf %58, %59 : vector<2x128xf32>
    %61 = arith.negf %60 : vector<2x128xf32>
    %62 = math.exp %61 : vector<2x128xf32>
    %cst_28 = arith.constant 1.000000e+00 : f32
    %63 = vector.broadcast %cst_28 : f32 to vector<2x128xf32>
    %64 = arith.addf %63, %62 : vector<2x128xf32>
    %65 = arith.divf %63, %64 : vector<2x128xf32>
    %66 = vector.extract_strided_slice %60 {offsets = [0, 64], sizes = [2, 32], strides = [1, 1]} : vector<2x128xf32> to vector<2x32xf32>
    %67 = math.tanh %66 : vector<2x32xf32>
    %68 = vector.extract_strided_slice %65 {offsets = [0, 32], sizes = [2, 32], strides = [1, 1]} : vector<2x128xf32> to vector<2x32xf32>
    %69 = arith.mulf %68, %33 : vector<2x32xf32>
    %70 = vector.extract_strided_slice %65 {offsets = [0, 0], sizes = [2, 32], strides = [1, 1]} : vector<2x128xf32> to vector<2x32xf32>
    %71 = arith.mulf %70, %67 : vector<2x32xf32>
    %72 = arith.addf %69, %71 : vector<2x32xf32>
    %73 = vector.extract_strided_slice %65 {offsets = [0, 96], sizes = [2, 32], strides = [1, 1]} : vector<2x128xf32> to vector<2x32xf32>
    %74 = math.tanh %72 : vector<2x32xf32>
    %75 = arith.mulf %73, %74 : vector<2x32xf32>
    %cst_29 = arith.constant dense<0.000000e+00> : vector<2x128xf32>
    %76 = tpu.matmul %75, %1, %cst_29 {dimension_numbers = #tpu.dot_dimension_numbers<[1], [0], [0], [1], [0, 0, 1, 1], [], []>} : vector<2x32xf32>, vector<32x128xf32>, vector<2x128xf32> -> vector<2x128xf32>
    %77 = vector.broadcast %5 : vector<1x128xf32> to vector<2x128xf32>
    %78 = arith.addf %76, %77 : vector<2x128xf32>
    %cst_30 = arith.constant dense<0.000000e+00> : vector<2x128xf32>
    %79 = tpu.matmul %56, %3, %cst_30 {dimension_numbers = #tpu.dot_dimension_numbers<[1], [0], [0], [1], [0, 0, 1, 1], [], []>} : vector<2x32xf32>, vector<32x128xf32>, vector<2x128xf32> -> vector<2x128xf32>
    %80 = arith.addf %78, %79 : vector<2x128xf32>
    %81 = arith.negf %80 : vector<2x128xf32>
    %82 = math.exp %81 : vector<2x128xf32>
    %cst_31 = arith.constant 1.000000e+00 : f32
    %83 = vector.broadcast %cst_31 : f32 to vector<2x128xf32>
    %84 = arith.addf %83, %82 : vector<2x128xf32>
    %85 = arith.divf %83, %84 : vector<2x128xf32>
    %86 = vector.extract_strided_slice %80 {offsets = [0, 64], sizes = [2, 32], strides = [1, 1]} : vector<2x128xf32> to vector<2x32xf32>
    %87 = math.tanh %86 : vector<2x32xf32>
    %88 = vector.extract_strided_slice %85 {offsets = [0, 32], sizes = [2, 32], strides = [1, 1]} : vector<2x128xf32> to vector<2x32xf32>
    %89 = arith.mulf %88, %53 : vector<2x32xf32>
    %90 = vector.extract_strided_slice %85 {offsets = [0, 0], sizes = [2, 32], strides = [1, 1]} : vector<2x128xf32> to vector<2x32xf32>
    %91 = arith.mulf %90, %87 : vector<2x32xf32>
    %92 = arith.addf %89, %91 : vector<2x32xf32>
    %93 = vector.extract_strided_slice %85 {offsets = [0, 96], sizes = [2, 32], strides = [1, 1]} : vector<2x128xf32> to vector<2x32xf32>
    %94 = math.tanh %92 : vector<2x32xf32>
    %95 = arith.mulf %93, %94 : vector<2x32xf32>
    %96 = vector.extract_strided_slice %13 {offsets = [0, 2, 0], sizes = [2, 1, 128], strides = [1, 1, 1]} : vector<2x8x128xf32> to vector<2x1x128xf32>
    %97 = vector.shape_cast %96 : vector<2x1x128xf32> to vector<2x128xf32>
    %cst_32 = arith.constant dense<0.000000e+00> : vector<2x128xf32>
    %98 = tpu.matmul %75, %2, %cst_32 {dimension_numbers = #tpu.dot_dimension_numbers<[1], [0], [0], [1], [0, 0, 1, 1], [], []>} : vector<2x32xf32>, vector<32x128xf32>, vector<2x128xf32> -> vector<2x128xf32>
    %99 = arith.addf %97, %98 : vector<2x128xf32>
    %100 = arith.negf %99 : vector<2x128xf32>
    %101 = math.exp %100 : vector<2x128xf32>
    %cst_33 = arith.constant 1.000000e+00 : f32
    %102 = vector.broadcast %cst_33 : f32 to vector<2x128xf32>
    %103 = arith.addf %102, %101 : vector<2x128xf32>
    %104 = arith.divf %102, %103 : vector<2x128xf32>
    %105 = vector.extract_strided_slice %99 {offsets = [0, 64], sizes = [2, 32], strides = [1, 1]} : vector<2x128xf32> to vector<2x32xf32>
    %106 = math.tanh %105 : vector<2x32xf32>
    %107 = vector.extract_strided_slice %104 {offsets = [0, 32], sizes = [2, 32], strides = [1, 1]} : vector<2x128xf32> to vector<2x32xf32>
    %108 = arith.mulf %107, %72 : vector<2x32xf32>
    %109 = vector.extract_strided_slice %104 {offsets = [0, 0], sizes = [2, 32], strides = [1, 1]} : vector<2x128xf32> to vector<2x32xf32>
    %110 = arith.mulf %109, %106 : vector<2x32xf32>
    %111 = arith.addf %108, %110 : vector<2x32xf32>
    %112 = vector.extract_strided_slice %104 {offsets = [0, 96], sizes = [2, 32], strides = [1, 1]} : vector<2x128xf32> to vector<2x32xf32>
    %113 = math.tanh %111 : vector<2x32xf32>
    %114 = arith.mulf %112, %113 : vector<2x32xf32>
    %cst_34 = arith.constant dense<0.000000e+00> : vector<2x128xf32>
    %115 = tpu.matmul %114, %1, %cst_34 {dimension_numbers = #tpu.dot_dimension_numbers<[1], [0], [0], [1], [0, 0, 1, 1], [], []>} : vector<2x32xf32>, vector<32x128xf32>, vector<2x128xf32> -> vector<2x128xf32>
    %116 = vector.broadcast %5 : vector<1x128xf32> to vector<2x128xf32>
    %117 = arith.addf %115, %116 : vector<2x128xf32>
    %cst_35 = arith.constant dense<0.000000e+00> : vector<2x128xf32>
    %118 = tpu.matmul %95, %3, %cst_35 {dimension_numbers = #tpu.dot_dimension_numbers<[1], [0], [0], [1], [0, 0, 1, 1], [], []>} : vector<2x32xf32>, vector<32x128xf32>, vector<2x128xf32> -> vector<2x128xf32>
    %119 = arith.addf %117, %118 : vector<2x128xf32>
    %120 = arith.negf %119 : vector<2x128xf32>
    %121 = math.exp %120 : vector<2x128xf32>
    %cst_36 = arith.constant 1.000000e+00 : f32
    %122 = vector.broadcast %cst_36 : f32 to vector<2x128xf32>
    %123 = arith.addf %122, %121 : vector<2x128xf32>
    %124 = arith.divf %122, %123 : vector<2x128xf32>
    %125 = vector.extract_strided_slice %119 {offsets = [0, 64], sizes = [2, 32], strides = [1, 1]} : vector<2x128xf32> to vector<2x32xf32>
    %126 = math.tanh %125 : vector<2x32xf32>
    %127 = vector.extract_strided_slice %124 {offsets = [0, 32], sizes = [2, 32], strides = [1, 1]} : vector<2x128xf32> to vector<2x32xf32>
    %128 = arith.mulf %127, %92 : vector<2x32xf32>
    %129 = vector.extract_strided_slice %124 {offsets = [0, 0], sizes = [2, 32], strides = [1, 1]} : vector<2x128xf32> to vector<2x32xf32>
    %130 = arith.mulf %129, %126 : vector<2x32xf32>
    %131 = arith.addf %128, %130 : vector<2x32xf32>
    %132 = vector.extract_strided_slice %124 {offsets = [0, 96], sizes = [2, 32], strides = [1, 1]} : vector<2x128xf32> to vector<2x32xf32>
    %133 = math.tanh %131 : vector<2x32xf32>
    %134 = arith.mulf %132, %133 : vector<2x32xf32>
    %135 = vector.extract_strided_slice %13 {offsets = [0, 3, 0], sizes = [2, 1, 128], strides = [1, 1, 1]} : vector<2x8x128xf32> to vector<2x1x128xf32>
    %136 = vector.shape_cast %135 : vector<2x1x128xf32> to vector<2x128xf32>
    %cst_37 = arith.constant dense<0.000000e+00> : vector<2x128xf32>
    %137 = tpu.matmul %114, %2, %cst_37 {dimension_numbers = #tpu.dot_dimension_numbers<[1], [0], [0], [1], [0, 0, 1, 1], [], []>} : vector<2x32xf32>, vector<32x128xf32>, vector<2x128xf32> -> vector<2x128xf32>
    %138 = arith.addf %136, %137 : vector<2x128xf32>
    %139 = arith.negf %138 : vector<2x128xf32>
    %140 = math.exp %139 : vector<2x128xf32>
    %cst_38 = arith.constant 1.000000e+00 : f32
    %141 = vector.broadcast %cst_38 : f32 to vector<2x128xf32>
    %142 = arith.addf %141, %140 : vector<2x128xf32>
    %143 = arith.divf %141, %142 : vector<2x128xf32>
    %144 = vector.extract_strided_slice %138 {offsets = [0, 64], sizes = [2, 32], strides = [1, 1]} : vector<2x128xf32> to vector<2x32xf32>
    %145 = math.tanh %144 : vector<2x32xf32>
    %146 = vector.extract_strided_slice %143 {offsets = [0, 32], sizes = [2, 32], strides = [1, 1]} : vector<2x128xf32> to vector<2x32xf32>
    %147 = arith.mulf %146, %111 : vector<2x32xf32>
    %148 = vector.extract_strided_slice %143 {offsets = [0, 0], sizes = [2, 32], strides = [1, 1]} : vector<2x128xf32> to vector<2x32xf32>
    %149 = arith.mulf %148, %145 : vector<2x32xf32>
    %150 = arith.addf %147, %149 : vector<2x32xf32>
    %151 = vector.extract_strided_slice %143 {offsets = [0, 96], sizes = [2, 32], strides = [1, 1]} : vector<2x128xf32> to vector<2x32xf32>
    %152 = math.tanh %150 : vector<2x32xf32>
    %153 = arith.mulf %151, %152 : vector<2x32xf32>
    %cst_39 = arith.constant dense<0.000000e+00> : vector<2x128xf32>
    %154 = tpu.matmul %153, %1, %cst_39 {dimension_numbers = #tpu.dot_dimension_numbers<[1], [0], [0], [1], [0, 0, 1, 1], [], []>} : vector<2x32xf32>, vector<32x128xf32>, vector<2x128xf32> -> vector<2x128xf32>
    %155 = vector.broadcast %5 : vector<1x128xf32> to vector<2x128xf32>
    %156 = arith.addf %154, %155 : vector<2x128xf32>
    %cst_40 = arith.constant dense<0.000000e+00> : vector<2x128xf32>
    %157 = tpu.matmul %134, %3, %cst_40 {dimension_numbers = #tpu.dot_dimension_numbers<[1], [0], [0], [1], [0, 0, 1, 1], [], []>} : vector<2x32xf32>, vector<32x128xf32>, vector<2x128xf32> -> vector<2x128xf32>
    %158 = arith.addf %156, %157 : vector<2x128xf32>
    %159 = arith.negf %158 : vector<2x128xf32>
    %160 = math.exp %159 : vector<2x128xf32>
    %cst_41 = arith.constant 1.000000e+00 : f32
    %161 = vector.broadcast %cst_41 : f32 to vector<2x128xf32>
    %162 = arith.addf %161, %160 : vector<2x128xf32>
    %163 = arith.divf %161, %162 : vector<2x128xf32>
    %164 = vector.extract_strided_slice %158 {offsets = [0, 64], sizes = [2, 32], strides = [1, 1]} : vector<2x128xf32> to vector<2x32xf32>
    %165 = math.tanh %164 : vector<2x32xf32>
    %166 = vector.extract_strided_slice %163 {offsets = [0, 32], sizes = [2, 32], strides = [1, 1]} : vector<2x128xf32> to vector<2x32xf32>
    %167 = arith.mulf %166, %131 : vector<2x32xf32>
    %168 = vector.extract_strided_slice %163 {offsets = [0, 0], sizes = [2, 32], strides = [1, 1]} : vector<2x128xf32> to vector<2x32xf32>
    %169 = arith.mulf %168, %165 : vector<2x32xf32>
    %170 = arith.addf %167, %169 : vector<2x32xf32>
    %171 = vector.extract_strided_slice %163 {offsets = [0, 96], sizes = [2, 32], strides = [1, 1]} : vector<2x128xf32> to vector<2x32xf32>
    %172 = math.tanh %170 : vector<2x32xf32>
    %173 = arith.mulf %171, %172 : vector<2x32xf32>
    %174 = vector.extract_strided_slice %13 {offsets = [0, 4, 0], sizes = [2, 1, 128], strides = [1, 1, 1]} : vector<2x8x128xf32> to vector<2x1x128xf32>
    %175 = vector.shape_cast %174 : vector<2x1x128xf32> to vector<2x128xf32>
    %cst_42 = arith.constant dense<0.000000e+00> : vector<2x128xf32>
    %176 = tpu.matmul %153, %2, %cst_42 {dimension_numbers = #tpu.dot_dimension_numbers<[1], [0], [0], [1], [0, 0, 1, 1], [], []>} : vector<2x32xf32>, vector<32x128xf32>, vector<2x128xf32> -> vector<2x128xf32>
    %177 = arith.addf %175, %176 : vector<2x128xf32>
    %178 = arith.negf %177 : vector<2x128xf32>
    %179 = math.exp %178 : vector<2x128xf32>
    %cst_43 = arith.constant 1.000000e+00 : f32
    %180 = vector.broadcast %cst_43 : f32 to vector<2x128xf32>
    %181 = arith.addf %180, %179 : vector<2x128xf32>
    %182 = arith.divf %180, %181 : vector<2x128xf32>
    %183 = vector.extract_strided_slice %177 {offsets = [0, 64], sizes = [2, 32], strides = [1, 1]} : vector<2x128xf32> to vector<2x32xf32>
    %184 = math.tanh %183 : vector<2x32xf32>
    %185 = vector.extract_strided_slice %182 {offsets = [0, 32], sizes = [2, 32], strides = [1, 1]} : vector<2x128xf32> to vector<2x32xf32>
    %186 = arith.mulf %185, %150 : vector<2x32xf32>
    %187 = vector.extract_strided_slice %182 {offsets = [0, 0], sizes = [2, 32], strides = [1, 1]} : vector<2x128xf32> to vector<2x32xf32>
    %188 = arith.mulf %187, %184 : vector<2x32xf32>
    %189 = arith.addf %186, %188 : vector<2x32xf32>
    %190 = vector.extract_strided_slice %182 {offsets = [0, 96], sizes = [2, 32], strides = [1, 1]} : vector<2x128xf32> to vector<2x32xf32>
    %191 = math.tanh %189 : vector<2x32xf32>
    %192 = arith.mulf %190, %191 : vector<2x32xf32>
    %cst_44 = arith.constant dense<0.000000e+00> : vector<2x128xf32>
    %193 = tpu.matmul %192, %1, %cst_44 {dimension_numbers = #tpu.dot_dimension_numbers<[1], [0], [0], [1], [0, 0, 1, 1], [], []>} : vector<2x32xf32>, vector<32x128xf32>, vector<2x128xf32> -> vector<2x128xf32>
    %194 = vector.broadcast %5 : vector<1x128xf32> to vector<2x128xf32>
    %195 = arith.addf %193, %194 : vector<2x128xf32>
    %cst_45 = arith.constant dense<0.000000e+00> : vector<2x128xf32>
    %196 = tpu.matmul %173, %3, %cst_45 {dimension_numbers = #tpu.dot_dimension_numbers<[1], [0], [0], [1], [0, 0, 1, 1], [], []>} : vector<2x32xf32>, vector<32x128xf32>, vector<2x128xf32> -> vector<2x128xf32>
    %197 = arith.addf %195, %196 : vector<2x128xf32>
    %198 = arith.negf %197 : vector<2x128xf32>
    %199 = math.exp %198 : vector<2x128xf32>
    %cst_46 = arith.constant 1.000000e+00 : f32
    %200 = vector.broadcast %cst_46 : f32 to vector<2x128xf32>
    %201 = arith.addf %200, %199 : vector<2x128xf32>
    %202 = arith.divf %200, %201 : vector<2x128xf32>
    %203 = vector.extract_strided_slice %197 {offsets = [0, 64], sizes = [2, 32], strides = [1, 1]} : vector<2x128xf32> to vector<2x32xf32>
    %204 = math.tanh %203 : vector<2x32xf32>
    %205 = vector.extract_strided_slice %202 {offsets = [0, 32], sizes = [2, 32], strides = [1, 1]} : vector<2x128xf32> to vector<2x32xf32>
    %206 = arith.mulf %205, %170 : vector<2x32xf32>
    %207 = vector.extract_strided_slice %202 {offsets = [0, 0], sizes = [2, 32], strides = [1, 1]} : vector<2x128xf32> to vector<2x32xf32>
    %208 = arith.mulf %207, %204 : vector<2x32xf32>
    %209 = arith.addf %206, %208 : vector<2x32xf32>
    %210 = vector.extract_strided_slice %202 {offsets = [0, 96], sizes = [2, 32], strides = [1, 1]} : vector<2x128xf32> to vector<2x32xf32>
    %211 = math.tanh %209 : vector<2x32xf32>
    %212 = arith.mulf %210, %211 : vector<2x32xf32>
    %213 = vector.extract_strided_slice %13 {offsets = [0, 5, 0], sizes = [2, 1, 128], strides = [1, 1, 1]} : vector<2x8x128xf32> to vector<2x1x128xf32>
    %214 = vector.shape_cast %213 : vector<2x1x128xf32> to vector<2x128xf32>
    %cst_47 = arith.constant dense<0.000000e+00> : vector<2x128xf32>
    %215 = tpu.matmul %192, %2, %cst_47 {dimension_numbers = #tpu.dot_dimension_numbers<[1], [0], [0], [1], [0, 0, 1, 1], [], []>} : vector<2x32xf32>, vector<32x128xf32>, vector<2x128xf32> -> vector<2x128xf32>
    %216 = arith.addf %214, %215 : vector<2x128xf32>
    %217 = arith.negf %216 : vector<2x128xf32>
    %218 = math.exp %217 : vector<2x128xf32>
    %cst_48 = arith.constant 1.000000e+00 : f32
    %219 = vector.broadcast %cst_48 : f32 to vector<2x128xf32>
    %220 = arith.addf %219, %218 : vector<2x128xf32>
    %221 = arith.divf %219, %220 : vector<2x128xf32>
    %222 = vector.extract_strided_slice %216 {offsets = [0, 64], sizes = [2, 32], strides = [1, 1]} : vector<2x128xf32> to vector<2x32xf32>
    %223 = math.tanh %222 : vector<2x32xf32>
    %224 = vector.extract_strided_slice %221 {offsets = [0, 32], sizes = [2, 32], strides = [1, 1]} : vector<2x128xf32> to vector<2x32xf32>
    %225 = arith.mulf %224, %189 : vector<2x32xf32>
    %226 = vector.extract_strided_slice %221 {offsets = [0, 0], sizes = [2, 32], strides = [1, 1]} : vector<2x128xf32> to vector<2x32xf32>
    %227 = arith.mulf %226, %223 : vector<2x32xf32>
    %228 = arith.addf %225, %227 : vector<2x32xf32>
    %229 = vector.extract_strided_slice %221 {offsets = [0, 96], sizes = [2, 32], strides = [1, 1]} : vector<2x128xf32> to vector<2x32xf32>
    %230 = math.tanh %228 : vector<2x32xf32>
    %231 = arith.mulf %229, %230 : vector<2x32xf32>
    %cst_49 = arith.constant dense<0.000000e+00> : vector<2x128xf32>
    %232 = tpu.matmul %231, %1, %cst_49 {dimension_numbers = #tpu.dot_dimension_numbers<[1], [0], [0], [1], [0, 0, 1, 1], [], []>} : vector<2x32xf32>, vector<32x128xf32>, vector<2x128xf32> -> vector<2x128xf32>
    %233 = vector.broadcast %5 : vector<1x128xf32> to vector<2x128xf32>
    %234 = arith.addf %232, %233 : vector<2x128xf32>
    %cst_50 = arith.constant dense<0.000000e+00> : vector<2x128xf32>
    %235 = tpu.matmul %212, %3, %cst_50 {dimension_numbers = #tpu.dot_dimension_numbers<[1], [0], [0], [1], [0, 0, 1, 1], [], []>} : vector<2x32xf32>, vector<32x128xf32>, vector<2x128xf32> -> vector<2x128xf32>
    %236 = arith.addf %234, %235 : vector<2x128xf32>
    %237 = arith.negf %236 : vector<2x128xf32>
    %238 = math.exp %237 : vector<2x128xf32>
    %cst_51 = arith.constant 1.000000e+00 : f32
    %239 = vector.broadcast %cst_51 : f32 to vector<2x128xf32>
    %240 = arith.addf %239, %238 : vector<2x128xf32>
    %241 = arith.divf %239, %240 : vector<2x128xf32>
    %242 = vector.extract_strided_slice %236 {offsets = [0, 64], sizes = [2, 32], strides = [1, 1]} : vector<2x128xf32> to vector<2x32xf32>
    %243 = math.tanh %242 : vector<2x32xf32>
    %244 = vector.extract_strided_slice %241 {offsets = [0, 32], sizes = [2, 32], strides = [1, 1]} : vector<2x128xf32> to vector<2x32xf32>
    %245 = arith.mulf %244, %209 : vector<2x32xf32>
    %246 = vector.extract_strided_slice %241 {offsets = [0, 0], sizes = [2, 32], strides = [1, 1]} : vector<2x128xf32> to vector<2x32xf32>
    %247 = arith.mulf %246, %243 : vector<2x32xf32>
    %248 = arith.addf %245, %247 : vector<2x32xf32>
    %249 = vector.extract_strided_slice %241 {offsets = [0, 96], sizes = [2, 32], strides = [1, 1]} : vector<2x128xf32> to vector<2x32xf32>
    %250 = math.tanh %248 : vector<2x32xf32>
    %251 = arith.mulf %249, %250 : vector<2x32xf32>
    %252 = vector.extract_strided_slice %13 {offsets = [0, 6, 0], sizes = [2, 1, 128], strides = [1, 1, 1]} : vector<2x8x128xf32> to vector<2x1x128xf32>
    %253 = vector.shape_cast %252 : vector<2x1x128xf32> to vector<2x128xf32>
    %cst_52 = arith.constant dense<0.000000e+00> : vector<2x128xf32>
    %254 = tpu.matmul %231, %2, %cst_52 {dimension_numbers = #tpu.dot_dimension_numbers<[1], [0], [0], [1], [0, 0, 1, 1], [], []>} : vector<2x32xf32>, vector<32x128xf32>, vector<2x128xf32> -> vector<2x128xf32>
    %255 = arith.addf %253, %254 : vector<2x128xf32>
    %256 = arith.negf %255 : vector<2x128xf32>
    %257 = math.exp %256 : vector<2x128xf32>
    %cst_53 = arith.constant 1.000000e+00 : f32
    %258 = vector.broadcast %cst_53 : f32 to vector<2x128xf32>
    %259 = arith.addf %258, %257 : vector<2x128xf32>
    %260 = arith.divf %258, %259 : vector<2x128xf32>
    %261 = vector.extract_strided_slice %255 {offsets = [0, 64], sizes = [2, 32], strides = [1, 1]} : vector<2x128xf32> to vector<2x32xf32>
    %262 = math.tanh %261 : vector<2x32xf32>
    %263 = vector.extract_strided_slice %260 {offsets = [0, 32], sizes = [2, 32], strides = [1, 1]} : vector<2x128xf32> to vector<2x32xf32>
    %264 = arith.mulf %263, %228 : vector<2x32xf32>
    %265 = vector.extract_strided_slice %260 {offsets = [0, 0], sizes = [2, 32], strides = [1, 1]} : vector<2x128xf32> to vector<2x32xf32>
    %266 = arith.mulf %265, %262 : vector<2x32xf32>
    %267 = arith.addf %264, %266 : vector<2x32xf32>
    %268 = vector.extract_strided_slice %260 {offsets = [0, 96], sizes = [2, 32], strides = [1, 1]} : vector<2x128xf32> to vector<2x32xf32>
    %269 = math.tanh %267 : vector<2x32xf32>
    %270 = arith.mulf %268, %269 : vector<2x32xf32>
    %cst_54 = arith.constant dense<0.000000e+00> : vector<2x128xf32>
    %271 = tpu.matmul %270, %1, %cst_54 {dimension_numbers = #tpu.dot_dimension_numbers<[1], [0], [0], [1], [0, 0, 1, 1], [], []>} : vector<2x32xf32>, vector<32x128xf32>, vector<2x128xf32> -> vector<2x128xf32>
    %272 = vector.broadcast %5 : vector<1x128xf32> to vector<2x128xf32>
    %273 = arith.addf %271, %272 : vector<2x128xf32>
    %cst_55 = arith.constant dense<0.000000e+00> : vector<2x128xf32>
    %274 = tpu.matmul %251, %3, %cst_55 {dimension_numbers = #tpu.dot_dimension_numbers<[1], [0], [0], [1], [0, 0, 1, 1], [], []>} : vector<2x32xf32>, vector<32x128xf32>, vector<2x128xf32> -> vector<2x128xf32>
    %275 = arith.addf %273, %274 : vector<2x128xf32>
    %276 = arith.negf %275 : vector<2x128xf32>
    %277 = math.exp %276 : vector<2x128xf32>
    %cst_56 = arith.constant 1.000000e+00 : f32
    %278 = vector.broadcast %cst_56 : f32 to vector<2x128xf32>
    %279 = arith.addf %278, %277 : vector<2x128xf32>
    %280 = arith.divf %278, %279 : vector<2x128xf32>
    %281 = vector.extract_strided_slice %275 {offsets = [0, 64], sizes = [2, 32], strides = [1, 1]} : vector<2x128xf32> to vector<2x32xf32>
    %282 = math.tanh %281 : vector<2x32xf32>
    %283 = vector.extract_strided_slice %280 {offsets = [0, 32], sizes = [2, 32], strides = [1, 1]} : vector<2x128xf32> to vector<2x32xf32>
    %284 = arith.mulf %283, %248 : vector<2x32xf32>
    %285 = vector.extract_strided_slice %280 {offsets = [0, 0], sizes = [2, 32], strides = [1, 1]} : vector<2x128xf32> to vector<2x32xf32>
    %286 = arith.mulf %285, %282 : vector<2x32xf32>
    %287 = arith.addf %284, %286 : vector<2x32xf32>
    %288 = vector.extract_strided_slice %280 {offsets = [0, 96], sizes = [2, 32], strides = [1, 1]} : vector<2x128xf32> to vector<2x32xf32>
    %289 = math.tanh %287 : vector<2x32xf32>
    %290 = arith.mulf %288, %289 : vector<2x32xf32>
    %291 = vector.extract_strided_slice %13 {offsets = [0, 7, 0], sizes = [2, 1, 128], strides = [1, 1, 1]} : vector<2x8x128xf32> to vector<2x1x128xf32>
    %292 = vector.shape_cast %291 : vector<2x1x128xf32> to vector<2x128xf32>
    %cst_57 = arith.constant dense<0.000000e+00> : vector<2x128xf32>
    %293 = tpu.matmul %270, %2, %cst_57 {dimension_numbers = #tpu.dot_dimension_numbers<[1], [0], [0], [1], [0, 0, 1, 1], [], []>} : vector<2x32xf32>, vector<32x128xf32>, vector<2x128xf32> -> vector<2x128xf32>
    %294 = arith.addf %292, %293 : vector<2x128xf32>
    %295 = arith.negf %294 : vector<2x128xf32>
    %296 = math.exp %295 : vector<2x128xf32>
    %cst_58 = arith.constant 1.000000e+00 : f32
    %297 = vector.broadcast %cst_58 : f32 to vector<2x128xf32>
    %298 = arith.addf %297, %296 : vector<2x128xf32>
    %299 = arith.divf %297, %298 : vector<2x128xf32>
    %300 = vector.extract_strided_slice %294 {offsets = [0, 64], sizes = [2, 32], strides = [1, 1]} : vector<2x128xf32> to vector<2x32xf32>
    %301 = math.tanh %300 : vector<2x32xf32>
    %302 = vector.extract_strided_slice %299 {offsets = [0, 32], sizes = [2, 32], strides = [1, 1]} : vector<2x128xf32> to vector<2x32xf32>
    %303 = arith.mulf %302, %267 : vector<2x32xf32>
    %304 = vector.extract_strided_slice %299 {offsets = [0, 0], sizes = [2, 32], strides = [1, 1]} : vector<2x128xf32> to vector<2x32xf32>
    %305 = arith.mulf %304, %301 : vector<2x32xf32>
    %306 = arith.addf %303, %305 : vector<2x32xf32>
    %307 = vector.extract_strided_slice %299 {offsets = [0, 96], sizes = [2, 32], strides = [1, 1]} : vector<2x128xf32> to vector<2x32xf32>
    %308 = math.tanh %306 : vector<2x32xf32>
    %309 = arith.mulf %307, %308 : vector<2x32xf32>
    %cst_59 = arith.constant dense<0.000000e+00> : vector<2x128xf32>
    %310 = tpu.matmul %309, %1, %cst_59 {dimension_numbers = #tpu.dot_dimension_numbers<[1], [0], [0], [1], [0, 0, 1, 1], [], []>} : vector<2x32xf32>, vector<32x128xf32>, vector<2x128xf32> -> vector<2x128xf32>
    %311 = vector.broadcast %5 : vector<1x128xf32> to vector<2x128xf32>
    %312 = arith.addf %310, %311 : vector<2x128xf32>
    %cst_60 = arith.constant dense<0.000000e+00> : vector<2x128xf32>
    %313 = tpu.matmul %290, %3, %cst_60 {dimension_numbers = #tpu.dot_dimension_numbers<[1], [0], [0], [1], [0, 0, 1, 1], [], []>} : vector<2x32xf32>, vector<32x128xf32>, vector<2x128xf32> -> vector<2x128xf32>
    %314 = arith.addf %312, %313 : vector<2x128xf32>
    %315 = arith.negf %314 : vector<2x128xf32>
    %316 = math.exp %315 : vector<2x128xf32>
    %cst_61 = arith.constant 1.000000e+00 : f32
    %317 = vector.broadcast %cst_61 : f32 to vector<2x128xf32>
    %318 = arith.addf %317, %316 : vector<2x128xf32>
    %319 = arith.divf %317, %318 : vector<2x128xf32>
    %320 = vector.extract_strided_slice %314 {offsets = [0, 64], sizes = [2, 32], strides = [1, 1]} : vector<2x128xf32> to vector<2x32xf32>
    %321 = math.tanh %320 : vector<2x32xf32>
    %322 = vector.extract_strided_slice %319 {offsets = [0, 32], sizes = [2, 32], strides = [1, 1]} : vector<2x128xf32> to vector<2x32xf32>
    %323 = arith.mulf %322, %287 : vector<2x32xf32>
    %324 = vector.extract_strided_slice %319 {offsets = [0, 0], sizes = [2, 32], strides = [1, 1]} : vector<2x128xf32> to vector<2x32xf32>
    %325 = arith.mulf %324, %321 : vector<2x32xf32>
    %326 = arith.addf %323, %325 : vector<2x32xf32>
    %327 = vector.extract_strided_slice %319 {offsets = [0, 96], sizes = [2, 32], strides = [1, 1]} : vector<2x128xf32> to vector<2x32xf32>
    %328 = math.tanh %326 : vector<2x32xf32>
    %329 = arith.mulf %327, %328 : vector<2x32xf32>
    %330 = vector.shape_cast %56 : vector<2x32xf32> to vector<2x1x32xf32>
    %331 = vector.shape_cast %95 : vector<2x32xf32> to vector<2x1x32xf32>
    %332 = vector.shape_cast %134 : vector<2x32xf32> to vector<2x1x32xf32>
    %333 = vector.shape_cast %173 : vector<2x32xf32> to vector<2x1x32xf32>
    %334 = vector.shape_cast %212 : vector<2x32xf32> to vector<2x1x32xf32>
    %335 = vector.shape_cast %251 : vector<2x32xf32> to vector<2x1x32xf32>
    %336 = vector.shape_cast %290 : vector<2x32xf32> to vector<2x1x32xf32>
    %337 = vector.shape_cast %329 : vector<2x32xf32> to vector<2x1x32xf32>
    %338 = tpu.concatenate %330, %331, %332, %333, %334, %335, %336, %337 in 1 : vector<2x1x32xf32>, vector<2x1x32xf32>, vector<2x1x32xf32>, vector<2x1x32xf32>, vector<2x1x32xf32>, vector<2x1x32xf32>, vector<2x1x32xf32>, vector<2x1x32xf32> -> vector<2x8x32xf32>
    %339 = vector.shape_cast %338 : vector<2x8x32xf32> to vector<16x32xf32>
    %cst_62 = arith.constant dense<0.000000e+00> : vector<16x4xf32>
    %340 = tpu.matmul %339, %6, %cst_62 {dimension_numbers = #tpu.dot_dimension_numbers<[1], [0], [0], [1], [0, 0, 1, 1], [], []>} : vector<16x32xf32>, vector<32x4xf32>, vector<16x4xf32> -> vector<16x4xf32>
    %341 = vector.broadcast %7 : vector<1x4xf32> to vector<16x4xf32>
    %342 = arith.addf %340, %341 : vector<16x4xf32>
    %343 = vector.shape_cast %342 : vector<16x4xf32> to vector<2x8x4xf32>
    %c0_63 = arith.constant 0 : index
    %c0_64 = arith.constant 0 : index
    %c0_65 = arith.constant 0 : index
    %344 = vector.load %arg10[%c0_63, %c0_64, %c0_65] : memref<2x8x4xf32, #tpu.memory_space<vmem>>, vector<2x8x4xf32>
    tpu.vector_store %arg10[%c0_63, %c0_64, %c0_65], %343 {strides = array<i32>} : memref<2x8x4xf32, #tpu.memory_space<vmem>>, vector<2x8x4xf32>,
    return
  }
  func.func @transform_0(%arg0: i32) -> (i32, i32, i32) {
    %c0_i32 = arith.constant 0 : i32
    %c0_i32_0 = arith.constant 0 : i32
    %c0_i32_1 = arith.constant 0 : i32
    return %arg0, %c0_i32, %c0_i32_0 : i32, i32, i32
  }
  func.func @transform_1(%arg0: i32) -> (i32, i32) {
    %c0_i32 = arith.constant 0 : i32
    %c0_i32_0 = arith.constant 0 : i32
    %c0_i32_1 = arith.constant 0 : i32
    return %c0_i32, %c0_i32_0 : i32, i32
  }
  func.func @transform_2(%arg0: i32) -> (i32, i32) {
    %c0_i32 = arith.constant 0 : i32
    %c0_i32_0 = arith.constant 0 : i32
    %c0_i32_1 = arith.constant 0 : i32
    return %c0_i32, %c0_i32_0 : i32, i32
  }
  func.func @transform_3(%arg0: i32) -> (i32, i32) {
    %c0_i32 = arith.constant 0 : i32
    %c0_i32_0 = arith.constant 0 : i32
    %c0_i32_1 = arith.constant 0 : i32
    return %c0_i32, %c0_i32_0 : i32, i32
  }
  func.func @transform_4(%arg0: i32) -> (i32, i32) {
    %c0_i32 = arith.constant 0 : i32
    %c0_i32_0 = arith.constant 0 : i32
    %c0_i32_1 = arith.constant 0 : i32
    return %c0_i32, %c0_i32_0 : i32, i32
  }
  func.func @transform_5(%arg0: i32) -> (i32, i32) {
    %c0_i32 = arith.constant 0 : i32
    %c0_i32_0 = arith.constant 0 : i32
    %c0_i32_1 = arith.constant 0 : i32
    return %c0_i32, %c0_i32_0 : i32, i32
  }
  func.func @transform_6(%arg0: i32) -> (i32, i32) {
    %c0_i32 = arith.constant 0 : i32
    %c0_i32_0 = arith.constant 0 : i32
    %c0_i32_1 = arith.constant 0 : i32
    return %c0_i32, %c0_i32_0 : i32, i32
  }
  func.func @transform_7(%arg0: i32) -> (i32, i32) {
    %c0_i32 = arith.constant 0 : i32
    %c0_i32_0 = arith.constant 0 : i32
    %c0_i32_1 = arith.constant 0 : i32
    return %c0_i32, %c0_i32_0 : i32, i32
  }
  func.func @transform_8(%arg0: i32) -> (i32, i32) {
    %c0_i32 = arith.constant 0 : i32
    %c0_i32_0 = arith.constant 0 : i32
    %c0_i32_1 = arith.constant 0 : i32
    return %c0_i32, %c0_i32_0 : i32, i32
  }
  func.func @transform_9(%arg0: i32) -> (i32, i32, i32) {
    %c0_i32 = arith.constant 0 : i32
    %c0_i32_0 = arith.constant 0 : i32
    %c0_i32_1 = arith.constant 0 : i32
    return %arg0, %c0_i32, %c0_i32_0 : i32, i32, i32
  }
}

</mosaic_0001>

<bundles_post_ra>
// kernel: lstm_model_forward.1
= control target key start
LH: loop header
LB: loop body
LE: loop exit
PB: predicated region body
PF: predicated region fallthrough
CT: control target
= control target key end

     0   :  { %14 = vsyncpa [#allocation3], 0  ;;  %s4633_s0 = inlined_call_operand.hbm [shape: f32[2,8,16], index: 0, kind: input, shape index: {}]   ;;  %s4634_s1 = inlined_call_operand.hbm [shape: f32[16,128], index: 1, kind: input, shape index: {}]   ;;  %s4635_s2 = inlined_call_operand.vmem [shape: f32[32,128], index: 2, kind: input, shape index: {}]   ;;  %s4636_s3 = inlined_call_operand.vmem [shape: f32[1,128], index: 3, kind: input, shape index: {}]   ;;  %s4637_s4 = inlined_call_operand.vmem [shape: f32[32,128], index: 4, kind: input, shape index: {}]   ;;  %s4638_s5 = inlined_call_operand.hbm [shape: f32[32,128], index: 5, kind: input, shape index: {}]   ;;  %s4639_s6 = inlined_call_operand.vmem [shape: f32[1,128], index: 6, kind: input, shape index: {}]   ;;  %s4640_s7 = inlined_call_operand.vmem [shape: f32[32,4], index: 7, kind: input, shape index: {}]   ;;  %s4641_s8 = inlined_call_operand.hbm [shape: f32[1,4], index: 8, kind: input, shape index: {}]   ;;  %s4642_s9 = inlined_call_operand.vmem [shape: f32[2,8,4], index: 9, kind: output, shape index: {}]  }
   0x1   :  { %15 = vsyncpa [#allocation5], 0 }
   0x2   :  { %16 = vsyncpa [#allocation8], 0  ;;  %s3987_s30 = smov [#allocation4]   ;;  %s3988_s11 = smov [#allocation2]  }
   0x3   :  { %s34_s10 = sshll.u32 %s3987_s30, 4  ;;  %s22_s12 = sshll.u32 %s3988_s11, 4  ;;  %s35_s10 = int_to_ptr.vmem [resolvable:$true] %s34_s10  ;;  %s4049_s12 = int_to_ptr.vmem [resolvable:$true] %s22_s12 }
   0x4   :  { %s3893_s15 = scalar_lea.hbm %s4634_s1, 256 }
   0x5   :  { %p3894_p0 = scmp.ne.s32.totalorder %s4634_s1, %s3893_s15  ;;  %p3897_p1 = scmp.lt.u32.totalorder %s3893_s15, %s4634_s1 }
   0x7   :  { %p3899_p2 = pnand %p3897_p1, %p3894_p0 }
   0x9   :  { %3902 = shalt.err (!%p3899_p2)
}
   0xa   :  { %s3903_s20 = scalar_lea.vmem %s35_s10, 256  ;;  %p3908_p4 = scmp.lt.s32.totalorder %s35_s10, %s35_s10 }
   0xb   :  { %p3904_p3 = scmp.ne.s32.totalorder %s35_s10, %s3903_s20  ;;  %p3909_p5 = scmp.lt.s32.totalorder %s3903_s20, %s3903_s20 }
   0xd   :  { %p3910_p6 = por %p3909_p5, %p3908_p4 }
   0xf   :  { %p3911_p7 = pnand %p3910_p6, %p3904_p3 }
  0x11   :  { %3914 = shalt.err (!%p3911_p7)
}
  0x12   :  { %s3989_s21 = smov 128   ;;  %s3990_s22 = smov 8  }
  0x13   :  { %40 = dma.hbm_to_vmem [thread:$0]  %s4634_s1, 256, %s35_s10, [#allocation5], %s3989_s21, %s3989_s21, %s3990_s22  }
  0x14   :  { %s3915_s27 = scalar_lea.hbm %s4633_s0, 256 }
  0x15   :  { %p3916_p8 = scmp.ne.s32.totalorder %s4633_s0, %s3915_s27  ;;  %p3919_p9 = scmp.lt.u32.totalorder %s3915_s27, %s4633_s0 }
  0x17   :  { %p3921_p10 = pnand %p3919_p9, %p3916_p8 }
  0x19   :  { %3924 = shalt.err (!%p3921_p10)
}
  0x1a   :  { %s3925_s13 = scalar_lea.vmem %s4049_s12, 256  ;;  %p3930_p12 = scmp.lt.s32.totalorder %s4049_s12, %s4049_s12 }
  0x1b   :  { %p3926_p11 = scmp.ne.s32.totalorder %s4049_s12, %s3925_s13  ;;  %p3931_p13 = scmp.lt.s32.totalorder %s3925_s13, %s3925_s13 }
  0x1d   :  { %p3932_p0 = por %p3931_p13, %p3930_p12 }
  0x1f   :  { %p3933_p1 = pnand %p3932_p0, %p3926_p11 }
  0x21   :  { %3936 = shalt.err (!%p3933_p1)
}
  0x22   :  { %28 = dma.hbm_to_vmem [thread:$0]  %s4633_s0, 256, %s4049_s12, [#allocation3], %s3989_s21, %s3989_s21, %s3990_s22  }
  0x23   :  { %s3991_s14 = smov [#allocation6]   ;;  %s3992_s16 = smov [#allocation7]  }
  0x24   :  { %s52_s15 = sshll.u32 %s3991_s14, 4  ;;  %s69_s17 = sshll.u32 %s3992_s16, 4  ;;  %s53_s15 = int_to_ptr.vmem [resolvable:$true] %s52_s15  ;;  %s70_s17 = int_to_ptr.vmem [resolvable:$true] %s69_s17 }
  0x25   :  { %s3937_s20 = scalar_lea.hbm %s4638_s5, 512 }
  0x26   :  { %p3938_p2 = scmp.ne.s32.totalorder %s4638_s5, %s3937_s20  ;;  %p3941_p3 = scmp.lt.u32.totalorder %s3937_s20, %s4638_s5 }
  0x28   :  { %p3943_p4 = pnand %p3941_p3, %p3938_p2 }
  0x2a   :  { %3946 = shalt.err (!%p3943_p4)
}
  0x2b   :  { %s3947_s0 = scalar_lea.vmem %s53_s15, 512  ;;  %p3952_p6 = scmp.lt.s32.totalorder %s53_s15, %s53_s15 }
  0x2c   :  { %p3948_p5 = scmp.ne.s32.totalorder %s53_s15, %s3947_s0  ;;  %p3953_p7 = scmp.lt.s32.totalorder %s3947_s0, %s3947_s0 }
  0x2e   :  { %p3954_p8 = por %p3953_p7, %p3952_p6 }
  0x30   :  { %p3955_p9 = pnand %p3954_p8, %p3948_p5 }
  0x32   :  { %3958 = shalt.err (!%p3955_p9)
}
  0x33   :  { %58 = dma.hbm_to_vmem [thread:$0]  %s4638_s5, 512, %s53_s15, [#allocation5], %s3989_s21, %s3989_s21, %s3990_s22  }
  0x34   :  { %s3959_s30 = scalar_lea.hbm %s4641_s8, 16 }
  0x35   :  { %p3960_p10 = scmp.ne.s32.totalorder %s4641_s8, %s3959_s30  ;;  %p3963_p11 = scmp.lt.u32.totalorder %s3959_s30, %s4641_s8 }
  0x37   :  { %p3965_p12 = pnand %p3963_p11, %p3960_p10 }
  0x39   :  { %3968 = shalt.err (!%p3965_p12)
}
  0x3a   :  { %s3969_s14 = scalar_lea.vmem %s70_s17, 16  ;;  %s3973_s16 = scalar_lea.vmem %s70_s17, 32 }
  0x3b   :  { %p3970_p13 = scmp.ne.s32.totalorder %s70_s17, %s3969_s14  ;;  %p3974_p0 = scmp.lt.s32.totalorder %s70_s17, %s70_s17 }
  0x3c   :  { %p3975_p1 = scmp.lt.s32.totalorder %s3973_s16, %s3969_s14 }
  0x3e   :  { %p3976_p2 = por %p3975_p1, %p3974_p0 }
  0x40   :  { %p3977_p3 = pnand %p3976_p2, %p3970_p13 }
  0x42   :  { %3980 = shalt.err (!%p3977_p3)
}
  0x43   :  { %72 = dma.hbm_to_vmem [thread:$0]  %s4641_s8, 16, %s70_s17, [#allocation8]  }
  0x44   :  { %3981 = dma.done.wait [#allocation3], 256  }
  0x45   :  { %3982 = vsyncadd [#allocation3], 4294967040 }
  0x46   :  { %3983 = dma.done.wait [#allocation5], 768  }
  0x47   :  { %3984 = vsyncadd [#allocation5], 4294966528 }
  0x48   :  { %3985 = dma.done.wait [#allocation8], 16  }
  0x49   :  { %3986 = vsyncadd [#allocation8], 4294967280  ;;  %v3993_v0 = vmov 0.0|0.0   ;;  %vm3994_vm0 = vmmov 0   ;;  %v3995_v1 = vmov 0.0   ;;  %vm114_vm1 = vcmask 130048  }
  0x4a   :  { %3512 = vmatprep.subr.bf16.mxu1 %v3993_v0  ;;  %3241 = vmatprep.mubr.msk.f32.mxu1 %vm3994_vm0, %v3995_v1  ;;  %v85_v2 = vld [vmem:[#allocation4] sm:$0xff]  ;;  %v86_v3 = vld [vmem:[#allocation4 + $0x8] sm:$0xff]  ;;  %v91_v4 = vld [vmem:[%s4635_s2] sm:$0xff]  ;;  %s3996_s25 = smov 64   ;;  %vm333_vm2 = vcmask 1041409   ;;  %vm196_vm3 = vcmask 261120  }
  0x4b   :  { %v3508_v5 = vpack.c.bf16 %v86_v3, %v85_v2  ;;  %v92_v6 = vld [vmem:[%s4635_s2 + $0x8] sm:$0xff]  ;;  %v106_v7 = vld [vmem:[#allocation2] sm:$0xff]  ;;  %v93_v9 = vld [vmem:[%s4635_s2 + $0x10] sm:$0xff]  ;;  %vm2921_vm4 = vcmask 1040384   ;;  %vm2924_vm5 = vcmask 1041408   ;;  %vm2927_vm6 = vcmask 1042432  }
  0x4c   :  { %v4122_v8 = vpack.c.bf16 %v92_v6, %v91_v4  ;;  %3230 = vmatprep.mubr.msk.f32.mxu0 %vm114_vm1, %v106_v7  ;;  %v94_v10 = vld [vmem:[%s4635_s2 + $0x18] sm:$0xff]  ;;  %v107_v11 = vld [vmem:[#allocation2 + $0x8] sm:$0xff]  ;;  %v3043_v15 = vld [vmem:[%s4636_s3] ss:$0 sm:$0xff]  ;;  %s3997_s3 = smov 32   ;;  %vm2930_vm7 = vcmask 1043456  }
  0x4d   :  { %3509 = vmatprep.subr.bf16.mxu0 %v3508_v5  ;;  %v4132_v12 = vpack.c.bf16 %v94_v10, %v93_v9  ;;  %v87_v43 = vld [vmem:[%s4637_s4] sm:$0xff]  ;;  %v88_v44 = vld [vmem:[%s4637_s4 + $0x8] sm:$0xff]  ;;  %v89_v45 = vld [vmem:[%s4637_s4 + $0x10] sm:$0xff]  ;;  %vm2933_vm8 = vcmask 1044480   ;;  %vm2936_vm9 = vcmask 1045504   ;;  %vm2939_vm10 = vcmask 1046528  }
  0x4e   :  { %3514 = vmatpush3.bf16.msra.mxu1 %v4122_v8  ;;  %3511 = vmatpush3.bf16.msra.mxu0 %v3508_v5  ;;  %v4176_v46 = vpack.c.bf16 %v88_v44, %v87_v43  ;;  %v90_v47 = vld [vmem:[%s4637_s4 + $0x18] sm:$0xff]  ;;  %v95_v57 = vld [vmem:[#allocation6] sm:$0xff]  ;;  %v96_v58 = vld [vmem:[#allocation6 + $0x8] sm:$0xff]  ;;  %vm3033_vm11 = vcmask 31744  }
  0x4f   :  { %3515 = vmatprep.subr.bf16.mxu1 %v3993_v0  ;;  %3518 = vmatprep.subr.bf16.mxu0 %v3993_v0  ;;  %v4182_v48 = vpack.c.bf16 %v90_v47, %v89_v45  ;;  %v4191_v59 = vpack.c.bf16 %v96_v58, %v95_v57  ;;  %v97_v60 = vld [vmem:[#allocation6 + $0x10] sm:$0xff]  ;;  %v98_v61 = vld [vmem:[#allocation6 + $0x18] sm:$0xff]  ;;  %v4221_v7 = vld [vmem:[%s4639_s6] ss:$0 sm:$0xff] }
  0x50   :  { %v4196_v63 = vpack.c.bf16 %v98_v61, %v97_v60 }
  0x51   :  { %3231 = vmatmul.mubr.msk.f32.vlgmr.msra.gmra.mrb[0].mxu0 %vm114_vm1, %v107_v11 }
  0x52   :  { %3517 = vmatpush3.bf16.msra.mxu1 %v4132_v12  ;;  %3252 = vmatprep.mubr.msk.f32.mxu0 %vm3994_vm0, %v3995_v1 }
  0x53   :  { %3530 = vmatprep.subr.bf16.mxu1 %v3993_v0  ;;  %3520 = vmatpush3.bf16.msra.mxu0 %v4176_v46 }
  0x54   :  { %3521 = vmatprep.subr.bf16.mxu0 %v3993_v0 }
  0x55   :  { %3242 = vmatmul.mubr.f32.vlgmr.msra.gmra.mrb[0].mxu1 %v3995_v1 }
  0x56   :  { %3532 = vmatpush3.bf16.msra.mxu1 %v4122_v8  ;;  %3274 = vmatprep.mubr.msk.f32.mxu1 %vm3994_vm0, %v3995_v1 }
  0x57   :  { %3533 = vmatprep.subr.bf16.mxu1 %v3993_v0  ;;  %3523 = vmatpush3.bf16.msra.mxu0 %v4182_v48 }
  0x58   :  { %3524 = vmatprep.subr.bf16.mxu0 %v3993_v0 }
  0x5a   :  { %3535 = vmatpush3.bf16.msra.mxu1 %v4132_v12 }
  0x5b   :  { %3536 = vmatprep.subr.bf16.mxu1 %v3993_v0 }
 0x124   :  { %v3232_v13 = vpop.f32.mrb[0].mxu0 }
 0x125   :  { %v187_v14 = vpop.f32.mrb[1].mxu0  ;;  %v4151_v16 = vadd.f32 %v3232_v13, %v3043_v15 }
 0x126   :  { %v4153_v20 = vadd.f32 %v3043_v15, %v187_v14 }
 0x128   :  { %v266_v17 = vpop.f32.mrb[0].mxu1 }
 0x129   :  { %v271_v18 = vrot.slane %v266_v17, 1  ;;  %v3243_v19 = vpop.f32.mrb[1].mxu1  ;;  %v274_v22 = vadd.f32 %v266_v17, %v4153_v20 }
 0x12b   :  { %v275_v21 = vadd.f32 %v271_v18, %v4151_v16  ;;  %v3046_v26 = vmul.f32 -1.442695, %v274_v22 }
 0x12d   :  { %3700 = vtanh.f32 %v275_v21  ;;  %v3047_v25 = vmul.f32 -1.442695, %v275_v21 }
 0x12e   :  { %3702 = vtanh.f32 %v274_v22 }
 0x12f   :  { %3704 = vpow2.f32 %v3047_v25 }
 0x130   :  { %3706 = vpow2.f32 %v3046_v26 }
 0x137   :  { %v3701_v23 = vpop.eup %3700 }
 0x138   :  { %296 = vrot.lane.b32.xlu0 %v3701_v23, %s3996_s25  ;;  %v3703_v24 = vpop.eup %3702 }
 0x139   :  { %v3705_v27 = vpop.eup %3704 }
 0x13a   :  { %v283_v28 = vadd.f32 1.0, %v3705_v27  ;;  %v3707_v29 = vpop.eup %3706 }
 0x13b   :  { %v282_v30 = vadd.f32 1.0, %v3707_v29 }
 0x13c   :  { %294 = vrot.lane.b32.xlu0 %v3703_v24, %s3996_s25  ;;  %3708 = vrcp.f32 %v283_v28 }
 0x13d   :  { %3710 = vrcp.f32 %v282_v30 }
 0x146   :  { %v3709_v31 = vpop.eup %3708 }
 0x147   :  { %v3711_v34 = vpop.eup %3710  ;;  %v291_v37 = vmul.f32 0.0, %v3709_v31 }
 0x148   :  { %v290_v40 = vmul.f32 0.0, %v3711_v34 }
 0x1aa   :  { %v297_v32 = vpop.permute.xlu0 %296 }
 0x1ab   :  { %v301_v33 = vmul.f32 %v3709_v31, %v297_v32 }
 0x1ad   :  { %306 = vrot.lane.b32.xlu1 %v301_v33, %s3997_s3 }
 0x1ae   :  { %v295_v35 = vpop.permute.xlu0 %294 }
 0x1af   :  { %v300_v36 = vmul.f32 %v3711_v34, %v295_v35 }
 0x1b1   :  { %304 = vrot.lane.b32.xlu1 %v300_v36, %s3997_s3 }
 0x21f   :  { %v307_v38 = vpop.permute.xlu1 %306 }
 0x220   :  { %v4161_v39 = vadd.f32 %v307_v38, %v291_v37 }
 0x222   :  { %3712 = vtanh.f32 %v4161_v39  ;;  %v597_v36 = vrot.slane %v4161_v39, 7 }
 0x223   :  { %v305_v41 = vpop.permute.xlu1 %304 }
 0x224   :  { %v4164_v42 = vadd.f32 %v305_v41, %v290_v40 }
 0x226   :  { %3714 = vtanh.f32 %v4164_v42  ;;  %v596_v38 = vrot.slane %v4164_v42, 7 }
 0x22c   :  { %v3713_v49 = vpop.eup %3712 }
 0x22d   :  { %318 = vrot.lane.b32.xlu0 %v3713_v49, %s3996_s25 }
 0x230   :  { %v3715_v50 = vpop.eup %3714 }
 0x231   :  { %316 = vrot.lane.b32.xlu1 %v3715_v50, %s3996_s25 }
 0x29f   :  { %v319_v51 = vpop.permute.xlu0 %318 }
 0x2a0   :  { %v323_v52 = vmul.f32 %v3709_v31, %v319_v51 }
 0x2a2   :  { %v332_v54 = vrot.slane %v323_v52, 7 }
 0x2a3   :  { %v317_v53 = vpop.permute.xlu1 %316 }
 0x2a4   :  { %v322_v55 = vmul.f32 %v3711_v34, %v317_v53 }
 0x2a6   :  { %v334_v56 = vsel %vm333_vm2, %v332_v54, %v322_v55 }
 0x2a7   :  { %335 = vrot.lane.b32.xlu0 %v334_v56, %s3997_s3 }
 0x319   :  { %v336_v62 = vpop.permute.xlu0 %335 }
 0x31a   :  { %3253 = vmatmul.mubr.msk.f32.vlgmr.msra.gmra.mrb[2].mxu0 %vm196_vm3, %v336_v62  ;;  %3275 = vmatmul.mubr.msk.f32.vlgmr.msra.gmra.mrb[2].mxu1 %vm196_vm3, %v336_v62 }
 0x31b   :  { %3526 = vmatpush3.bf16.msra.mxu0 %v4191_v59  ;;  %3263 = vmatprep.mubr.msk.f32.mxu0 %vm3994_vm0, %v3995_v1 }
 0x31c   :  { %3527 = vmatprep.subr.bf16.mxu0 %v3993_v0  ;;  %3538 = vmatpush3.bf16.msra.mxu1 %v4176_v46 }
 0x31d   :  { %3539 = vmatprep.subr.bf16.mxu1 %v3993_v0  ;;  %3285 = vmatprep.mubr.msk.f32.mxu1 %vm3994_vm0, %v3995_v1 }
 0x31f   :  { %3529 = vmatpush3.bf16.msra.mxu0 %v4196_v63 }
 0x320   :  { %3548 = vmatprep.subr.bf16.mxu0 %v3993_v0  ;;  %3541 = vmatpush3.bf16.msra.mxu1 %v4182_v48 }
 0x321   :  { %3542 = vmatprep.subr.bf16.mxu1 %v3993_v0 }
 0x322   :  { %3264 = vmatmul.mubr.f32.vlgmr.msra.gmra.mrb[2].mxu0 %v3995_v1 }
 0x323   :  { %3550 = vmatpush3.bf16.msra.mxu0 %v4122_v8  ;;  %3307 = vmatprep.mubr.msk.f32.mxu0 %vm3994_vm0, %v3995_v1 }
 0x324   :  { %3551 = vmatprep.subr.bf16.mxu0 %v3993_v0 }
 0x327   :  { %3553 = vmatpush3.bf16.msra.mxu0 %v4132_v12 }
 0x328   :  { %3554 = vmatprep.subr.bf16.mxu0 %v3993_v0 }
 0x3ed   :  { %v570_v2 = vpop.f32.mrb[2].mxu1 }
 0x3ee   :  { %v575_v3 = vrot.slane %v570_v2, 7  ;;  %v579_v4 = vadd.f32 %v570_v2, %v4151_v16  ;;  %v3276_v5 = vpop.f32.mrb[3].mxu1 }
 0x3f0   :  { %v578_v6 = vadd.f32 %v575_v3, %v4153_v20  ;;  %3716 = vtanh.f32 %v579_v4  ;;  %v3053_v17 = vmul.f32 -1.442695, %v579_v4 }
 0x3f2   :  { %3718 = vtanh.f32 %v578_v6  ;;  %v3052_v18 = vmul.f32 -1.442695, %v578_v6 }
 0x3f5   :  { %v475_v9 = vpop.f32.mrb[2].mxu0 }
 0x3f6   :  { %v3664_v10 = vadd.f32 %v4221_v7, %v475_v9  ;;  %v3265_v11 = vpop.f32.mrb[3].mxu0 }
 0x3f8   :  { %3720 = vtanh.f32 %v3664_v10  ;;  %v3050_v19 = vmul.f32 -1.442695, %v3664_v10 }
 0x3f9   :  { %3722 = vpow2.f32 %v3053_v17 }
 0x3fa   :  { %v3717_v13 = vpop.eup %3716  ;;  %3724 = vpow2.f32 %v3052_v18 }
 0x3fb   :  { %606 = vrot.lane.b32.xlu0 %v3717_v13, %s3996_s25  ;;  %3726 = vpow2.f32 %v3050_v19 }
 0x3fc   :  { %v3719_v14 = vpop.eup %3718 }
 0x3fd   :  { %604 = vrot.lane.b32.xlu1 %v3719_v14, %s3996_s25 }
 0x402   :  { %v3721_v15 = vpop.eup %3720 }
 0x403   :  { %489 = vrot.lane.b32.xlu1 %v3721_v15, %s3996_s25  ;;  %v3723_v21 = vpop.eup %3722 }
 0x404   :  { %v3725_v22 = vpop.eup %3724  ;;  %v587_v23 = vadd.f32 1.0, %v3723_v21 }
 0x405   :  { %v586_v24 = vadd.f32 1.0, %v3725_v22  ;;  %v3727_v25 = vpop.eup %3726 }
 0x406   :  { %3728 = vrcp.f32 %v587_v23  ;;  %v483_v26 = vadd.f32 1.0, %v3727_v25 }
 0x407   :  { %3730 = vrcp.f32 %v586_v24 }
 0x408   :  { %3732 = vrcp.f32 %v483_v26 }
 0x410   :  { %v3729_v27 = vpop.eup %3728 }
 0x411   :  { %v3731_v30 = vpop.eup %3730  ;;  %v601_v37 = vmul.f32 %v3729_v27, %v597_v36 }
 0x412   :  { %v3733_v33 = vpop.eup %3732  ;;  %v600_v43 = vmul.f32 %v3731_v30, %v596_v38 }
 0x413   :  { %v487_v47 = vmul.f32 0.0, %v3733_v33 }
 0x46d   :  { %v607_v28 = vpop.permute.xlu0 %606 }
 0x46e   :  { %v611_v29 = vmul.f32 %v3729_v27, %v607_v28 }
 0x46f   :  { %v605_v31 = vpop.permute.xlu1 %604 }
 0x470   :  { %616 = vrot.lane.b32.xlu1 %v611_v29, %s3997_s3  ;;  %v610_v32 = vmul.f32 %v3731_v30, %v605_v31 }
 0x472   :  { %614 = vrot.lane.b32.xlu0 %v610_v32, %s3997_s3 }
 0x475   :  { %v490_v34 = vpop.permute.xlu1 %489 }
 0x476   :  { %v492_v35 = vmul.f32 %v3733_v33, %v490_v34 }
 0x478   :  { %494 = vrot.lane.b32.xlu0 %v492_v35, %s3997_s3 }
 0x4e2   :  { %v617_v40 = vpop.permute.xlu1 %616 }
 0x4e3   :  { %v4232_v41 = vadd.f32 %v617_v40, %v601_v37 }
 0x4e4   :  { %v615_v44 = vpop.permute.xlu0 %614 }
 0x4e5   :  { %3734 = vtanh.f32 %v4232_v41  ;;  %v4235_v45 = vadd.f32 %v615_v44, %v600_v43  ;;  %v906_v38 = vrot.slane %v4232_v41, 7 }
 0x4e7   :  { %3736 = vtanh.f32 %v4235_v45  ;;  %v905_v37 = vrot.slane %v4235_v45, 7 }
 0x4ea   :  { %v495_v49 = vpop.permute.xlu0 %494 }
 0x4eb   :  { %v4238_v50 = vadd.f32 %v495_v49, %v487_v47 }
 0x4ed   :  { %3738 = vtanh.f32 %v4238_v50 }
 0x4ef   :  { %v3735_v39 = vpop.eup %3734 }
 0x4f0   :  { %628 = vrot.lane.b32.xlu0 %v3735_v39, %s3996_s25 }
 0x4f1   :  { %v3737_v42 = vpop.eup %3736 }
 0x4f2   :  { %626 = vrot.lane.b32.xlu1 %v3737_v42, %s3996_s25 }
 0x4f7   :  { %v3739_v51 = vpop.eup %3738 }
 0x4f8   :  { %500 = vrot.lane.b32.xlu1 %v3739_v51, %s3996_s25 }
 0x562   :  { %v629_v52 = vpop.permute.xlu0 %628 }
 0x563   :  { %v633_v55 = vmul.f32 %v3729_v27, %v629_v52 }
 0x564   :  { %v627_v53 = vpop.permute.xlu1 %626 }
 0x565   :  { %v632_v54 = vmul.f32 %v3731_v30, %v627_v53 }
 0x567   :  { %v636_v56 = vrot.slane %v632_v54, 1  ;;  %v3998_v54 = vmov 1966171168  }
 0x569   :  { %v637_v57 = vsel %vm333_vm2, %v633_v55, %v636_v56  ;;  %v2673_v55 = vunpack.c.l.s4 %v3998_v54  ;;  %v2675_v56 = vlaneseq }
 0x56a   :  { %v501_v58 = vpop.permute.xlu1 %500  ;;  %638 = vrot.lane.b32.xlu0 %v637_v57, %s3997_s3 }
 0x56b   :  { %v4246_v60 = vmul.f32 %v3733_v33, %v501_v58  ;;  %v2674_v57 = vunpack.c.0.s8 %v2673_v55  ;;  %v2676_v58 = vshrl.u32 %v2675_v56, 7 }
 0x56d   :  { %713 = vrot.lane.b32.xlu1 %v4246_v60, %s3997_s3 }
 0x5dc   :  { %v639_v61 = vpop.permute.xlu0 %638 }
 0x5dd   :  { %3286 = vmatmul.mubr.msk.f32.vlgmr.msra.gmra.mrb[4].mxu1 %vm196_vm3, %v639_v61  ;;  %3308 = vmatmul.mubr.msk.f32.vlgmr.msra.gmra.mrb[4].mxu0 %vm196_vm3, %v639_v61 }
 0x5de   :  { %3544 = vmatpush3.bf16.msra.mxu1 %v4191_v59  ;;  %3296 = vmatprep.mubr.msk.f32.mxu1 %vm3994_vm0, %v3995_v1 }
 0x5df   :  { %3545 = vmatprep.subr.bf16.mxu1 %v3993_v0  ;;  %3556 = vmatpush3.bf16.msra.mxu0 %v4176_v46  ;;  %v714_v62 = vpop.permute.xlu1 %713 }
 0x5e0   :  { %3557 = vmatprep.subr.bf16.mxu0 %v3993_v0  ;;  %3318 = vmatprep.mubr.msk.f32.mxu0 %vm3994_vm0, %v3995_v1 }
 0x5e2   :  { %3547 = vmatpush3.bf16.msra.mxu1 %v4196_v63 }
 0x5e3   :  { %3566 = vmatprep.subr.bf16.mxu1 %v3993_v0  ;;  %3559 = vmatpush3.bf16.msra.mxu0 %v4182_v48 }
 0x5e4   :  { %3560 = vmatprep.subr.bf16.mxu0 %v3993_v0 }
 0x5e5   :  { %3297 = vmatmul.mubr.msk.f32.vlgmr.msra.gmra.mrb[4].mxu1 %vm196_vm3, %v714_v62 }
 0x5e6   :  { %3568 = vmatpush3.bf16.msra.mxu1 %v4122_v8  ;;  %3340 = vmatprep.mubr.msk.f32.mxu1 %vm3994_vm0, %v3995_v1 }
 0x5e7   :  { %3569 = vmatprep.subr.bf16.mxu1 %v3993_v0 }
 0x5ea   :  { %3571 = vmatpush3.bf16.msra.mxu1 %v4132_v12 }
 0x5eb   :  { %3572 = vmatprep.subr.bf16.mxu1 %v3993_v0 }
 0x6b0   :  { %v878_v2 = vpop.f32.mrb[4].mxu0 }
 0x6b1   :  { %v883_v3 = vrot.slane %v878_v2, 6  ;;  %v884_v4 = vrot.slane %v878_v2, 7  ;;  %v3309_v5 = vpop.f32.mrb[5].mxu0 }
 0x6b3   :  { %v887_v6 = vadd.f32 %v883_v3, %v4153_v20  ;;  %v888_v9 = vadd.f32 %v884_v4, %v4151_v16  ;;  %v4295_v3 = vsub.s32 %v2674_v57, %v2676_v58 }
 0x6b5   :  { %3740 = vtanh.f32 %v887_v6  ;;  %v3058_v18 = vmul.f32 -1.442695, %v887_v6  ;;  %v3059_v19 = vmul.f32 -1.442695, %v888_v9 }
 0x6b6   :  { %3742 = vtanh.f32 %v888_v9 }
 0x6b8   :  { %v783_v10 = vpop.f32.mrb[4].mxu1 }
 0x6b9   :  { %v3665_v11 = vadd.f32 %v4221_v7, %v783_v10  ;;  %v3298_v13 = vpop.f32.mrb[5].mxu1  ;;  %v2678_v10 = vrot.slane %v4246_v60, %v4295_v3 }
 0x6ba   :  { %v4301_v13 = vsub.s32 0, %v2676_v58 }
 0x6bb   :  { %3744 = vtanh.f32 %v3665_v11  ;;  %v3056_v21 = vmul.f32 -1.442695, %v3665_v11 }
 0x6bc   :  { %3746 = vpow2.f32 %v3058_v18 }
 0x6bd   :  { %3748 = vpow2.f32 %v3059_v19  ;;  %v2686_v19 = vrot.slane %v2678_v10, %v4295_v3 }
 0x6be   :  { %3750 = vpow2.f32 %v3056_v21 }
 0x6bf   :  { %v3741_v14 = vpop.eup %3740 }
 0x6c0   :  { %v3743_v15 = vpop.eup %3742  ;;  %913 = vrot.lane.b32.xlu0 %v3741_v14, %s3996_s25 }
 0x6c1   :  { %915 = vrot.lane.b32.xlu1 %v3743_v15, %s3996_s25  ;;  %v2679_v15 = vcombine.high %v2678_v10, %v2678_v10 }
 0x6c5   :  { %v3745_v17 = vpop.eup %3744 }
 0x6c6   :  { %797 = vrot.lane.b32.xlu0 %v3745_v17, %s3996_s25  ;;  %v3747_v22 = vpop.eup %3746 }
 0x6c7   :  { %v3749_v23 = vpop.eup %3748  ;;  %v895_v24 = vadd.f32 1.0, %v3747_v22  ;;  %v2693_v22 = vrot.slane %v2679_v15, %v4295_v3 }
 0x6c8   :  { %v896_v25 = vadd.f32 1.0, %v3749_v23  ;;  %v3751_v26 = vpop.eup %3750 }
 0x6c9   :  { %3752 = vrcp.f32 %v895_v24  ;;  %v791_v27 = vadd.f32 1.0, %v3751_v26 }
 0x6ca   :  { %3754 = vrcp.f32 %v896_v25 }
 0x6cb   :  { %3756 = vrcp.f32 %v791_v27 }
 0x6d3   :  { %v3753_v28 = vpop.eup %3752 }
 0x6d4   :  { %v3755_v30 = vpop.eup %3754  ;;  %v909_v40 = vmul.f32 %v3753_v28, %v905_v37 }
 0x6d5   :  { %v3757_v34 = vpop.eup %3756  ;;  %v910_v43 = vmul.f32 %v3755_v30, %v906_v38 }
 0x6d6   :  { %v795_v42 = vmul.f32 %v3757_v34, %v4238_v50 }
 0x732   :  { %v914_v29 = vpop.permute.xlu0 %913 }
 0x733   :  { %v916_v31 = vpop.permute.xlu1 %915  ;;  %v919_v32 = vmul.f32 %v3753_v28, %v914_v29 }
 0x734   :  { %v920_v33 = vmul.f32 %v3755_v30, %v916_v31 }
 0x735   :  { %923 = vrot.lane.b32.xlu1 %v919_v32, %s3997_s3 }
 0x736   :  { %925 = vrot.lane.b32.xlu0 %v920_v33, %s3997_s3 }
 0x738   :  { %v798_v35 = vpop.permute.xlu0 %797 }
 0x739   :  { %v800_v36 = vmul.f32 %v3757_v34, %v798_v35 }
 0x73b   :  { %802 = vrot.lane.b32.xlu1 %v800_v36, %s3997_s3 }
 0x7a7   :  { %v924_v44 = vpop.permute.xlu1 %923 }
 0x7a8   :  { %v926_v47 = vpop.permute.xlu0 %925  ;;  %v4282_v49 = vadd.f32 %v924_v44, %v909_v40 }
 0x7a9   :  { %v4284_v39 = vadd.f32 %v926_v47, %v910_v43 }
 0x7aa   :  { %3758 = vtanh.f32 %v4282_v49 }
 0x7ab   :  { %3760 = vtanh.f32 %v4284_v39 }
 0x7ad   :  { %v803_v51 = vpop.permute.xlu1 %802 }
 0x7ae   :  { %v4289_v52 = vadd.f32 %v803_v51, %v795_v42 }
 0x7b0   :  { %3762 = vtanh.f32 %v4289_v52 }
 0x7b4   :  { %v3759_v41 = vpop.eup %3758 }
 0x7b5   :  { %v3761_v45 = vpop.eup %3760  ;;  %935 = vrot.lane.b32.xlu0 %v3759_v41, %s3996_s25 }
 0x7b6   :  { %937 = vrot.lane.b32.xlu1 %v3761_v45, %s3996_s25 }
 0x7ba   :  { %v3763_v53 = vpop.eup %3762 }
 0x7bb   :  { %808 = vrot.lane.b32.xlu0 %v3763_v53, %s3996_s25 }
 0x827   :  { %v936_v50 = vpop.permute.xlu0 %935 }
 0x828   :  { %v938_v61 = vpop.permute.xlu1 %937  ;;  %v941_v62 = vmul.f32 %v3753_v28, %v936_v50 }
 0x829   :  { %v942_v2 = vmul.f32 %v3755_v30, %v938_v61 }
 0x82a   :  { %v945_v4 = vrot.slane %v941_v62, 2 }
 0x82b   :  { %v946_v5 = vrot.slane %v942_v2, 1 }
 0x82d   :  { %v947_v6 = vsel %vm333_vm2, %v946_v5, %v945_v4  ;;  %v809_v9 = vpop.permute.xlu0 %808  ;;  %v1215_v5 = vrot.slane %v4282_v49, 7 }
 0x82e   :  { %948 = vrot.lane.b32.xlu1 %v947_v6, %s3997_s3  ;;  %v811_v11 = vmul.f32 %v3757_v34, %v809_v9  ;;  %v1216_v6 = vrot.slane %v4284_v39, 7 }
 0x830   :  { %v2702_v14 = vrot.slane %v811_v11, %v4295_v3  ;;  %1023 = vrot.lane.b32.xlu0 %v811_v11, %s3997_s3 }
 0x832   :  { %v2703_v17 = vcombine.high %v2702_v14, %v2702_v14  ;;  %v2710_v18 = vrot.slane %v2702_v14, %v4295_v3 }
 0x834   :  { %v2717_v21 = vrot.slane %v2703_v17, %v4295_v3  ;;  %v2854_v60 = vrot.slane %v2710_v18, %v4301_v13 }
 0x836   :  { %v2858_v23 = vrot.slane %v2717_v21, %v4301_v13  ;;  %v4311_v24 = vsel %vm2921_vm4, %v2686_v19, %v2854_v60 }
 0x838   :  { %v4313_v25 = vsel %vm2921_vm4, %v2693_v22, %v2858_v23 }
 0x8a0   :  { %v949_v26 = vpop.permute.xlu1 %948 }
 0x8a1   :  { %3319 = vmatmul.mubr.msk.f32.vlgmr.msra.gmra.mrb[6].mxu0 %vm196_vm3, %v949_v26  ;;  %3341 = vmatmul.mubr.msk.f32.vlgmr.msra.gmra.mrb[6].mxu1 %vm196_vm3, %v949_v26 }
 0x8a2   :  { %3562 = vmatpush3.bf16.msra.mxu0 %v4191_v59  ;;  %3329 = vmatprep.mubr.msk.f32.mxu0 %vm3994_vm0, %v3995_v1  ;;  %v1024_v27 = vpop.permute.xlu0 %1023 }
 0x8a3   :  { %3563 = vmatprep.subr.bf16.mxu0 %v3993_v0  ;;  %3574 = vmatpush3.bf16.msra.mxu1 %v4176_v46 }
 0x8a4   :  { %3575 = vmatprep.subr.bf16.mxu1 %v3993_v0  ;;  %3351 = vmatprep.mubr.msk.f32.mxu1 %vm3994_vm0, %v3995_v1 }
 0x8a6   :  { %3565 = vmatpush3.bf16.msra.mxu0 %v4196_v63 }
 0x8a7   :  { %3584 = vmatprep.subr.bf16.mxu0 %v3993_v0  ;;  %3577 = vmatpush3.bf16.msra.mxu1 %v4182_v48 }
 0x8a8   :  { %3578 = vmatprep.subr.bf16.mxu1 %v3993_v0 }
 0x8a9   :  { %3330 = vmatmul.mubr.msk.f32.vlgmr.msra.gmra.mrb[6].mxu0 %vm196_vm3, %v1024_v27 }
 0x8aa   :  { %3586 = vmatpush3.bf16.msra.mxu0 %v4122_v8  ;;  %3373 = vmatprep.mubr.msk.f32.mxu0 %vm3994_vm0, %v3995_v1 }
 0x8ab   :  { %3587 = vmatprep.subr.bf16.mxu0 %v3993_v0 }
 0x8ae   :  { %3589 = vmatpush3.bf16.msra.mxu0 %v4132_v12 }
 0x8af   :  { %3590 = vmatprep.subr.bf16.mxu0 %v3993_v0 }
 0x974   :  { %v1188_v28 = vpop.f32.mrb[6].mxu1 }
 0x975   :  { %v1193_v29 = vrot.slane %v1188_v28, 5  ;;  %v1194_v30 = vrot.slane %v1188_v28, 6  ;;  %v3342_v31 = vpop.f32.mrb[7].mxu1 }
 0x977   :  { %v1197_v32 = vadd.f32 %v1193_v29, %v4153_v20  ;;  %v1198_v33 = vadd.f32 %v1194_v30, %v4151_v16 }
 0x979   :  { %3764 = vtanh.f32 %v1197_v32  ;;  %v3064_v43 = vmul.f32 -1.442695, %v1197_v32  ;;  %v3065_v44 = vmul.f32 -1.442695, %v1198_v33 }
 0x97a   :  { %3766 = vtanh.f32 %v1198_v33 }
 0x97c   :  { %v1093_v34 = vpop.f32.mrb[6].mxu0 }
 0x97d   :  { %v3666_v35 = vadd.f32 %v4221_v7, %v1093_v34  ;;  %v3331_v36 = vpop.f32.mrb[7].mxu0 }
 0x97f   :  { %3768 = vtanh.f32 %v3666_v35  ;;  %v3062_v47 = vmul.f32 -1.442695, %v3666_v35 }
 0x980   :  { %3770 = vpow2.f32 %v3064_v43 }
 0x981   :  { %3772 = vpow2.f32 %v3065_v44 }
 0x982   :  { %3774 = vpow2.f32 %v3062_v47 }
 0x983   :  { %v3765_v37 = vpop.eup %3764 }
 0x984   :  { %v3767_v38 = vpop.eup %3766  ;;  %1223 = vrot.lane.b32.xlu1 %v3765_v37, %s3996_s25 }
 0x985   :  { %1225 = vrot.lane.b32.xlu0 %v3767_v38, %s3996_s25 }
 0x989   :  { %v3769_v40 = vpop.eup %3768 }
 0x98a   :  { %1107 = vrot.lane.b32.xlu1 %v3769_v40, %s3996_s25  ;;  %v3771_v42 = vpop.eup %3770 }
 0x98b   :  { %v3773_v51 = vpop.eup %3772  ;;  %v1205_v41 = vadd.f32 1.0, %v3771_v42 }
 0x98c   :  { %v1206_v45 = vadd.f32 1.0, %v3773_v51  ;;  %v3775_v53 = vpop.eup %3774 }
 0x98d   :  { %3776 = vrcp.f32 %v1205_v41  ;;  %v1101_v54 = vadd.f32 1.0, %v3775_v53 }
 0x98e   :  { %3778 = vrcp.f32 %v1206_v45 }
 0x98f   :  { %3780 = vrcp.f32 %v1101_v54 }
 0x997   :  { %v3777_v55 = vpop.eup %3776 }
 0x998   :  { %v3779_v57 = vpop.eup %3778  ;;  %v1219_v9 = vmul.f32 %v3777_v55, %v1215_v5 }
 0x999   :  { %v3781_v62 = vpop.eup %3780  ;;  %v1220_v11 = vmul.f32 %v3779_v57, %v1216_v6 }
 0x99a   :  { %v1105_v18 = vmul.f32 %v3781_v62, %v4289_v52 }
 0x9f6   :  { %v1224_v56 = vpop.permute.xlu1 %1223 }
 0x9f7   :  { %v1229_v58 = vmul.f32 %v3777_v55, %v1224_v56  ;;  %v1226_v50 = vpop.permute.xlu0 %1225 }
 0x9f8   :  { %v1230_v61 = vmul.f32 %v3779_v57, %v1226_v50 }
 0x9f9   :  { %1233 = vrot.lane.b32.xlu0 %v1229_v58, %s3997_s3 }
 0x9fa   :  { %1235 = vrot.lane.b32.xlu1 %v1230_v61, %s3997_s3 }
 0x9fc   :  { %v1108_v2 = vpop.permute.xlu1 %1107 }
 0x9fd   :  { %v1110_v4 = vmul.f32 %v3781_v62, %v1108_v2 }
 0x9ff   :  { %1112 = vrot.lane.b32.xlu0 %v1110_v4, %s3997_s3 }
 0xa6b   :  { %v1234_v10 = vpop.permute.xlu0 %1233 }
 0xa6c   :  { %v4347_v14 = vadd.f32 %v1234_v10, %v1219_v9  ;;  %v1236_v15 = vpop.permute.xlu1 %1235 }
 0xa6d   :  { %v4349_v17 = vadd.f32 %v1236_v15, %v1220_v11 }
 0xa6e   :  { %3782 = vtanh.f32 %v4347_v14 }
 0xa6f   :  { %3784 = vtanh.f32 %v4349_v17 }
 0xa71   :  { %v1113_v19 = vpop.permute.xlu0 %1112 }
 0xa72   :  { %v4354_v21 = vadd.f32 %v1113_v19, %v1105_v18 }
 0xa74   :  { %3786 = vtanh.f32 %v4354_v21 }
 0xa78   :  { %v3783_v49 = vpop.eup %3782 }
 0xa79   :  { %v3785_v39 = vpop.eup %3784  ;;  %1245 = vrot.lane.b32.xlu1 %v3783_v49, %s3996_s25 }
 0xa7a   :  { %1247 = vrot.lane.b32.xlu0 %v3785_v39, %s3996_s25 }
 0xa7e   :  { %v3787_v60 = vpop.eup %3786 }
 0xa7f   :  { %1118 = vrot.lane.b32.xlu1 %v3787_v60, %s3996_s25 }
 0xaeb   :  { %v1246_v22 = vpop.permute.xlu1 %1245 }
 0xaec   :  { %v1251_v23 = vmul.f32 %v3777_v55, %v1246_v22  ;;  %v1248_v26 = vpop.permute.xlu0 %1247 }
 0xaed   :  { %v1252_v27 = vmul.f32 %v3779_v57, %v1248_v26  ;;  %v1526_v26 = vrot.slane %v4349_v17, 7 }
 0xaee   :  { %v1255_v28 = vrot.slane %v1251_v23, 3  ;;  %v1525_v23 = vrot.slane %v4347_v14, 7 }
 0xaef   :  { %v1256_v52 = vrot.slane %v1252_v27, 2 }
 0xaf1   :  { %v1257_v29 = vsel %vm333_vm2, %v1256_v52, %v1255_v28  ;;  %v1119_v30 = vpop.permute.xlu1 %1118 }
 0xaf2   :  { %1258 = vrot.lane.b32.xlu0 %v1257_v29, %s3997_s3  ;;  %v1121_v31 = vmul.f32 %v3781_v62, %v1119_v30 }
 0xaf4   :  { %v2724_v32 = vrot.slane %v1121_v31, %v4295_v3  ;;  %1333 = vrot.lane.b32.xlu1 %v1121_v31, %s3997_s3 }
 0xaf6   :  { %v2725_v33 = vcombine.high %v2724_v32, %v2724_v32  ;;  %v2732_v34 = vrot.slane %v2724_v32, %v4295_v3 }
 0xaf8   :  { %v2739_v35 = vrot.slane %v2725_v33, %v4295_v3  ;;  %v2864_v36 = vrot.slane %v2732_v34, %v4301_v13 }
 0xafa   :  { %v2868_v37 = vrot.slane %v2739_v35, %v4301_v13  ;;  %v4369_v38 = vsel %vm2924_vm5, %v4311_v24, %v2864_v36 }
 0xafc   :  { %v4372_v40 = vsel %vm2924_vm5, %v4313_v25, %v2868_v37 }
 0xb64   :  { %v1259_v43 = vpop.permute.xlu0 %1258 }
 0xb65   :  { %3352 = vmatmul.mubr.msk.f32.vlgmr.msra.gmra.mrb[8].mxu1 %vm196_vm3, %v1259_v43  ;;  %3374 = vmatmul.mubr.msk.f32.vlgmr.msra.gmra.mrb[8].mxu0 %vm196_vm3, %v1259_v43 }
 0xb66   :  { %3580 = vmatpush3.bf16.msra.mxu1 %v4191_v59  ;;  %3362 = vmatprep.mubr.msk.f32.mxu1 %vm3994_vm0, %v3995_v1  ;;  %v1334_v24 = vpop.permute.xlu1 %1333 }
 0xb67   :  { %3581 = vmatprep.subr.bf16.mxu1 %v3993_v0  ;;  %3592 = vmatpush3.bf16.msra.mxu0 %v4176_v46 }
 0xb68   :  { %3593 = vmatprep.subr.bf16.mxu0 %v3993_v0  ;;  %3384 = vmatprep.mubr.msk.f32.mxu0 %vm3994_vm0, %v3995_v1 }
 0xb6a   :  { %3583 = vmatpush3.bf16.msra.mxu1 %v4196_v63 }
 0xb6b   :  { %3602 = vmatprep.subr.bf16.mxu1 %v3993_v0  ;;  %3595 = vmatpush3.bf16.msra.mxu0 %v4182_v48 }
 0xb6c   :  { %3596 = vmatprep.subr.bf16.mxu0 %v3993_v0 }
 0xb6d   :  { %3363 = vmatmul.mubr.msk.f32.vlgmr.msra.gmra.mrb[8].mxu1 %vm196_vm3, %v1334_v24 }
 0xb6e   :  { %3604 = vmatpush3.bf16.msra.mxu1 %v4122_v8  ;;  %3406 = vmatprep.mubr.msk.f32.mxu1 %vm3994_vm0, %v3995_v1 }
 0xb6f   :  { %3605 = vmatprep.subr.bf16.mxu1 %v3993_v0 }
 0xb72   :  { %3607 = vmatpush3.bf16.msra.mxu1 %v4132_v12 }
 0xb73   :  { %3608 = vmatprep.subr.bf16.mxu1 %v3993_v0 }
 0xc38   :  { %v1498_v25 = vpop.f32.mrb[8].mxu0 }
 0xc39   :  { %v1503_v44 = vrot.slane %v1498_v25, 4  ;;  %v1504_v47 = vrot.slane %v1498_v25, 5  ;;  %v3375_v42 = vpop.f32.mrb[9].mxu0 }
 0xc3b   :  { %v1507_v51 = vadd.f32 %v1503_v44, %v4153_v20  ;;  %v1508_v41 = vadd.f32 %v1504_v47, %v4151_v16 }
 0xc3d   :  { %3788 = vtanh.f32 %v1507_v51  ;;  %v3070_v58 = vmul.f32 -1.442695, %v1507_v51  ;;  %v3071_v50 = vmul.f32 -1.442695, %v1508_v41 }
 0xc3e   :  { %3790 = vtanh.f32 %v1508_v41 }
 0xc40   :  { %v1403_v45 = vpop.f32.mrb[8].mxu1 }
 0xc41   :  { %v3667_v53 = vadd.f32 %v4221_v7, %v1403_v45  ;;  %v3364_v54 = vpop.f32.mrb[9].mxu1 }
 0xc43   :  { %3792 = vtanh.f32 %v3667_v53  ;;  %v3068_v61 = vmul.f32 -1.442695, %v3667_v53 }
 0xc44   :  { %3794 = vpow2.f32 %v3070_v58 }
 0xc45   :  { %3796 = vpow2.f32 %v3071_v50 }
 0xc46   :  { %3798 = vpow2.f32 %v3068_v61 }
 0xc47   :  { %v3789_v55 = vpop.eup %3788 }
 0xc48   :  { %v3791_v56 = vpop.eup %3790  ;;  %1533 = vrot.lane.b32.xlu0 %v3789_v55, %s3996_s25 }
 0xc49   :  { %1535 = vrot.lane.b32.xlu1 %v3791_v56, %s3996_s25 }
 0xc4d   :  { %v3793_v57 = vpop.eup %3792 }
 0xc4e   :  { %1417 = vrot.lane.b32.xlu0 %v3793_v57, %s3996_s25  ;;  %v3795_v62 = vpop.eup %3794 }
 0xc4f   :  { %v3797_v2 = vpop.eup %3796  ;;  %v1515_v4 = vadd.f32 1.0, %v3795_v62 }
 0xc50   :  { %v1516_v5 = vadd.f32 1.0, %v3797_v2  ;;  %v3799_v6 = vpop.eup %3798 }
 0xc51   :  { %3800 = vrcp.f32 %v1515_v4  ;;  %v1411_v9 = vadd.f32 1.0, %v3799_v6 }
 0xc52   :  { %3802 = vrcp.f32 %v1516_v5 }
 0xc53   :  { %3804 = vrcp.f32 %v1411_v9 }
 0xc5b   :  { %v3801_v10 = vpop.eup %3800 }
 0xc5c   :  { %v3803_v15 = vpop.eup %3802  ;;  %v1529_v27 = vmul.f32 %v3801_v10, %v1525_v23 }
 0xc5d   :  { %v3805_v39 = vpop.eup %3804  ;;  %v1530_v28 = vmul.f32 %v3803_v15, %v1526_v26 }
 0xc5e   :  { %v1415_v32 = vmul.f32 %v3805_v39, %v4354_v21 }
 0xcba   :  { %v1534_v11 = vpop.permute.xlu0 %1533 }
 0xcbb   :  { %v1536_v18 = vpop.permute.xlu1 %1535  ;;  %v1539_v19 = vmul.f32 %v3801_v10, %v1534_v11 }
 0xcbc   :  { %v1540_v49 = vmul.f32 %v3803_v15, %v1536_v18 }
 0xcbd   :  { %1543 = vrot.lane.b32.xlu1 %v1539_v19, %s3997_s3 }
 0xcbe   :  { %1545 = vrot.lane.b32.xlu0 %v1540_v49, %s3997_s3 }
 0xcc0   :  { %v1418_v60 = vpop.permute.xlu0 %1417 }
 0xcc1   :  { %v1420_v22 = vmul.f32 %v3805_v39, %v1418_v60 }
 0xcc3   :  { %1422 = vrot.lane.b32.xlu1 %v1420_v22, %s3997_s3 }
 0xd2f   :  { %v1544_v52 = vpop.permute.xlu1 %1543 }
 0xd30   :  { %v1546_v29 = vpop.permute.xlu0 %1545  ;;  %v4406_v30 = vadd.f32 %v1544_v52, %v1529_v27 }
 0xd31   :  { %v4408_v31 = vadd.f32 %v1546_v29, %v1530_v28 }
 0xd32   :  { %3806 = vtanh.f32 %v4406_v30 }
 0xd33   :  { %3808 = vtanh.f32 %v4408_v31 }
 0xd35   :  { %v1423_v33 = vpop.permute.xlu1 %1422 }
 0xd36   :  { %v4413_v34 = vadd.f32 %v1423_v33, %v1415_v32 }
 0xd38   :  { %3810 = vtanh.f32 %v4413_v34 }
 0xd3c   :  { %v3807_v14 = vpop.eup %3806 }
 0xd3d   :  { %v3809_v17 = vpop.eup %3808  ;;  %1555 = vrot.lane.b32.xlu0 %v3807_v14, %s3996_s25 }
 0xd3e   :  { %1557 = vrot.lane.b32.xlu1 %v3809_v17, %s3996_s25 }
 0xd42   :  { %v3811_v35 = vpop.eup %3810 }
 0xd43   :  { %1428 = vrot.lane.b32.xlu0 %v3811_v35, %s3996_s25 }
 0xdaf   :  { %v1556_v36 = vpop.permute.xlu0 %1555 }
 0xdb0   :  { %v1558_v37 = vpop.permute.xlu1 %1557  ;;  %v1561_v43 = vmul.f32 %v3801_v10, %v1556_v36  ;;  %v1835_v36 = vrot.slane %v4406_v30, 7 }
 0xdb1   :  { %v1562_v24 = vmul.f32 %v3803_v15, %v1558_v37  ;;  %v1836_v37 = vrot.slane %v4408_v31, 7 }
 0xdb2   :  { %v1565_v25 = vrot.slane %v1561_v43, 4 }
 0xdb3   :  { %v1566_v21 = vrot.slane %v1562_v24, 3 }
 0xdb5   :  { %v1567_v44 = vsel %vm333_vm2, %v1566_v21, %v1565_v25  ;;  %v1429_v47 = vpop.permute.xlu0 %1428 }
 0xdb6   :  { %1568 = vrot.lane.b32.xlu1 %v1567_v44, %s3997_s3  ;;  %v1431_v42 = vmul.f32 %v3805_v39, %v1429_v47 }
 0xdb8   :  { %v2746_v51 = vrot.slane %v1431_v42, %v4295_v3  ;;  %1643 = vrot.lane.b32.xlu0 %v1431_v42, %s3997_s3 }
 0xdba   :  { %v2747_v41 = vcombine.high %v2746_v51, %v2746_v51  ;;  %v2754_v45 = vrot.slane %v2746_v51, %v4295_v3 }
 0xdbc   :  { %v2761_v53 = vrot.slane %v2747_v41, %v4295_v3  ;;  %v2874_v54 = vrot.slane %v2754_v45, %v4301_v13 }
 0xdbe   :  { %v2878_v55 = vrot.slane %v2761_v53, %v4301_v13  ;;  %v4428_v56 = vsel %vm2927_vm6, %v4369_v38, %v2874_v54 }
 0xdc0   :  { %v4431_v57 = vsel %vm2927_vm6, %v4372_v40, %v2878_v55 }
 0xe28   :  { %v1569_v58 = vpop.permute.xlu1 %1568 }
 0xe29   :  { %3385 = vmatmul.mubr.msk.f32.vlgmr.msra.gmra.mrb[10].mxu0 %vm196_vm3, %v1569_v58  ;;  %3407 = vmatmul.mubr.msk.f32.vlgmr.msra.gmra.mrb[10].mxu1 %vm196_vm3, %v1569_v58 }
 0xe2a   :  { %3598 = vmatpush3.bf16.msra.mxu0 %v4191_v59  ;;  %3395 = vmatprep.mubr.msk.f32.mxu0 %vm3994_vm0, %v3995_v1  ;;  %v1644_v38 = vpop.permute.xlu0 %1643 }
 0xe2b   :  { %3599 = vmatprep.subr.bf16.mxu0 %v3993_v0  ;;  %3610 = vmatpush3.bf16.msra.mxu1 %v4176_v46 }
 0xe2c   :  { %3611 = vmatprep.subr.bf16.mxu1 %v3993_v0  ;;  %3417 = vmatprep.mubr.msk.f32.mxu1 %vm3994_vm0, %v3995_v1 }
 0xe2e   :  { %3601 = vmatpush3.bf16.msra.mxu0 %v4196_v63 }
 0xe2f   :  { %3620 = vmatprep.subr.bf16.mxu0 %v3993_v0  ;;  %3613 = vmatpush3.bf16.msra.mxu1 %v4182_v48 }
 0xe30   :  { %3614 = vmatprep.subr.bf16.mxu1 %v3993_v0 }
 0xe31   :  { %3396 = vmatmul.mubr.msk.f32.vlgmr.msra.gmra.mrb[10].mxu0 %vm196_vm3, %v1644_v38 }
 0xe32   :  { %3622 = vmatpush3.bf16.msra.mxu0 %v4122_v8  ;;  %3439 = vmatprep.mubr.msk.f32.mxu0 %vm3994_vm0, %v3995_v1 }
 0xe33   :  { %3623 = vmatprep.subr.bf16.mxu0 %v3993_v0 }
 0xe36   :  { %3625 = vmatpush3.bf16.msra.mxu0 %v4132_v12 }
 0xe37   :  { %3626 = vmatprep.subr.bf16.mxu0 %v3993_v0 }
 0xefc   :  { %v1808_v40 = vpop.f32.mrb[10].mxu1 }
 0xefd   :  { %v1813_v50 = vrot.slane %v1808_v40, 3  ;;  %v1814_v61 = vrot.slane %v1808_v40, 4  ;;  %v3408_v62 = vpop.f32.mrb[11].mxu1 }
 0xeff   :  { %v1817_v2 = vadd.f32 %v1813_v50, %v4153_v20  ;;  %v1818_v4 = vadd.f32 %v1814_v61, %v4151_v16 }
 0xf01   :  { %3812 = vtanh.f32 %v1817_v2  ;;  %v3076_v18 = vmul.f32 -1.442695, %v1817_v2  ;;  %v3077_v19 = vmul.f32 -1.442695, %v1818_v4 }
 0xf02   :  { %3814 = vtanh.f32 %v1818_v4 }
 0xf04   :  { %v1713_v5 = vpop.f32.mrb[10].mxu0 }
 0xf05   :  { %v3668_v6 = vadd.f32 %v4221_v7, %v1713_v5  ;;  %v3397_v9 = vpop.f32.mrb[11].mxu0 }
 0xf07   :  { %3816 = vtanh.f32 %v3668_v6  ;;  %v3074_v49 = vmul.f32 -1.442695, %v3668_v6 }
 0xf08   :  { %3818 = vpow2.f32 %v3076_v18 }
 0xf09   :  { %3820 = vpow2.f32 %v3077_v19 }
 0xf0a   :  { %3822 = vpow2.f32 %v3074_v49 }
 0xf0b   :  { %v3813_v10 = vpop.eup %3812 }
 0xf0c   :  { %v3815_v11 = vpop.eup %3814  ;;  %1843 = vrot.lane.b32.xlu1 %v3813_v10, %s3996_s25 }
 0xf0d   :  { %1845 = vrot.lane.b32.xlu0 %v3815_v11, %s3996_s25 }
 0xf11   :  { %v3817_v15 = vpop.eup %3816 }
 0xf12   :  { %1727 = vrot.lane.b32.xlu1 %v3817_v15, %s3996_s25  ;;  %v3819_v39 = vpop.eup %3818 }
 0xf13   :  { %v3821_v60 = vpop.eup %3820  ;;  %v1825_v7 = vadd.f32 1.0, %v3819_v39 }
 0xf14   :  { %v1826_v22 = vadd.f32 1.0, %v3821_v60  ;;  %v3823_v23 = vpop.eup %3822 }
 0xf15   :  { %3824 = vrcp.f32 %v1825_v7  ;;  %v1721_v26 = vadd.f32 1.0, %v3823_v23  ;;  %v4518_v7 = vld [vmem:[%s4639_s6] ss:$0 sm:$0xff] }
 0xf16   :  { %3826 = vrcp.f32 %v1826_v22 }
 0xf17   :  { %3828 = vrcp.f32 %v1721_v26 }
 0xf1f   :  { %v3825_v27 = vpop.eup %3824 }
 0xf20   :  { %v3827_v52 = vpop.eup %3826  ;;  %v1839_v43 = vmul.f32 %v3825_v27, %v1835_v36 }
 0xf21   :  { %v3829_v14 = vpop.eup %3828  ;;  %v1840_v25 = vmul.f32 %v3827_v52, %v1836_v37 }
 0xf22   :  { %v1725_v42 = vmul.f32 %v3829_v14, %v4413_v34 }
 0xf7e   :  { %v1844_v28 = vpop.permute.xlu1 %1843 }
 0xf7f   :  { %v1849_v29 = vmul.f32 %v3825_v27, %v1844_v28  ;;  %v1846_v32 = vpop.permute.xlu0 %1845 }
 0xf80   :  { %v1850_v33 = vmul.f32 %v3827_v52, %v1846_v32 }
 0xf81   :  { %1853 = vrot.lane.b32.xlu0 %v1849_v29, %s3997_s3 }
 0xf82   :  { %1855 = vrot.lane.b32.xlu1 %v1850_v33, %s3997_s3 }
 0xf84   :  { %v1728_v17 = vpop.permute.xlu1 %1727 }
 0xf85   :  { %v1730_v35 = vmul.f32 %v3829_v14, %v1728_v17 }
 0xf87   :  { %1732 = vrot.lane.b32.xlu0 %v1730_v35, %s3997_s3 }
 0xff3   :  { %v1854_v24 = vpop.permute.xlu0 %1853 }
 0xff4   :  { %v4465_v21 = vadd.f32 %v1854_v24, %v1839_v43  ;;  %v1856_v44 = vpop.permute.xlu1 %1855 }
 0xff5   :  { %v4467_v47 = vadd.f32 %v1856_v44, %v1840_v25 }
 0xff6   :  { %3830 = vtanh.f32 %v4465_v21 }
 0xff7   :  { %3832 = vtanh.f32 %v4467_v47 }
 0xff9   :  { %v1733_v51 = vpop.permute.xlu0 %1732 }
 0xffa   :  { %v4472_v41 = vadd.f32 %v1733_v51, %v1725_v42 }
 0xffc   :  { %3834 = vtanh.f32 %v4472_v41 }
0x1000   :  { %v3831_v30 = vpop.eup %3830 }
0x1001   :  { %v3833_v31 = vpop.eup %3832  ;;  %1865 = vrot.lane.b32.xlu1 %v3831_v30, %s3996_s25 }
0x1002   :  { %1867 = vrot.lane.b32.xlu0 %v3833_v31, %s3996_s25 }
0x1006   :  { %v3835_v45 = vpop.eup %3834 }
0x1007   :  { %1738 = vrot.lane.b32.xlu1 %v3835_v45, %s3996_s25  ;;  %v2145_v45 = vrot.slane %v4465_v21, 7 }
0x1073   :  { %v1866_v53 = vpop.permute.xlu1 %1865 }
0x1074   :  { %v1871_v54 = vmul.f32 %v3825_v27, %v1866_v53  ;;  %v1868_v55 = vpop.permute.xlu0 %1867  ;;  %v2146_v53 = vrot.slane %v4467_v47, 7 }
0x1075   :  { %v1872_v58 = vmul.f32 %v3827_v52, %v1868_v55 }
0x1076   :  { %v1875_v38 = vrot.slane %v1871_v54, 5 }
0x1077   :  { %v1876_v34 = vrot.slane %v1872_v58, 4 }
0x1079   :  { %v1877_v40 = vsel %vm333_vm2, %v1876_v34, %v1875_v38  ;;  %v1739_v50 = vpop.permute.xlu1 %1738 }
0x107a   :  { %1878 = vrot.lane.b32.xlu0 %v1877_v40, %s3997_s3  ;;  %v1741_v61 = vmul.f32 %v3829_v14, %v1739_v50 }
0x107c   :  { %v2768_v62 = vrot.slane %v1741_v61, %v4295_v3  ;;  %1953 = vrot.lane.b32.xlu1 %v1741_v61, %s3997_s3 }
0x107e   :  { %v2769_v2 = vcombine.high %v2768_v62, %v2768_v62  ;;  %v2776_v4 = vrot.slane %v2768_v62, %v4295_v3 }
0x1080   :  { %v2783_v5 = vrot.slane %v2769_v2, %v4295_v3  ;;  %v2884_v6 = vrot.slane %v2776_v4, %v4301_v13 }
0x1082   :  { %v2888_v9 = vrot.slane %v2783_v5, %v4301_v13  ;;  %v4487_v10 = vsel %vm2930_vm7, %v4428_v56, %v2884_v6 }
0x1084   :  { %v4490_v11 = vsel %vm2930_vm7, %v4431_v57, %v2888_v9 }
0x10ec   :  { %v1879_v15 = vpop.permute.xlu0 %1878 }
0x10ed   :  { %3418 = vmatmul.mubr.msk.f32.vlgmr.msra.gmra.mrb[12].mxu1 %vm196_vm3, %v1879_v15  ;;  %3440 = vmatmul.mubr.msk.f32.vlgmr.msra.gmra.mrb[12].mxu0 %vm196_vm3, %v1879_v15 }
0x10ee   :  { %3616 = vmatpush3.bf16.msra.mxu1 %v4191_v59  ;;  %3428 = vmatprep.mubr.msk.f32.mxu1 %vm3994_vm0, %v3995_v1  ;;  %v1954_v56 = vpop.permute.xlu1 %1953 }
0x10ef   :  { %3617 = vmatprep.subr.bf16.mxu1 %v3993_v0  ;;  %3628 = vmatpush3.bf16.msra.mxu0 %v4176_v46 }
0x10f0   :  { %3629 = vmatprep.subr.bf16.mxu0 %v3993_v0  ;;  %3450 = vmatprep.mubr.msk.f32.mxu0 %vm3994_vm0, %v3995_v1 }
0x10f2   :  { %3619 = vmatpush3.bf16.msra.mxu1 %v4196_v63 }
0x10f3   :  { %3638 = vmatprep.subr.bf16.mxu1 %v3993_v0  ;;  %3631 = vmatpush3.bf16.msra.mxu0 %v4182_v48 }
0x10f4   :  { %3632 = vmatprep.subr.bf16.mxu0 %v3993_v0 }
0x10f5   :  { %3429 = vmatmul.mubr.msk.f32.vlgmr.msra.gmra.mrb[12].mxu1 %vm196_vm3, %v1954_v56 }
0x10f6   :  { %3640 = vmatpush3.bf16.msra.mxu1 %v4122_v8  ;;  %3472 = vmatprep.mubr.msk.f32.mxu1 %vm3994_vm0, %v3995_v1 }
0x10f7   :  { %3641 = vmatprep.subr.bf16.mxu1 %v3993_v0 }
0x10fa   :  { %3643 = vmatpush3.bf16.msra.mxu1 %v4132_v12 }
0x10fb   :  { %3644 = vmatprep.subr.bf16.mxu1 %v3993_v0 }
0x11c0   :  { %v2118_v57 = vpop.f32.mrb[12].mxu0 }
0x11c1   :  { %v2123_v18 = vrot.slane %v2118_v57, 2  ;;  %v2124_v19 = vrot.slane %v2118_v57, 3  ;;  %v3441_v49 = vpop.f32.mrb[13].mxu0 }
0x11c3   :  { %v2127_v39 = vadd.f32 %v2123_v18, %v4153_v20  ;;  %v2128_v60 = vadd.f32 %v2124_v19, %v4151_v16 }
0x11c5   :  { %3836 = vtanh.f32 %v2127_v39  ;;  %v3082_v28 = vmul.f32 -1.442695, %v2127_v39  ;;  %v3083_v52 = vmul.f32 -1.442695, %v2128_v60 }
0x11c6   :  { %3838 = vtanh.f32 %v2128_v60 }
0x11c8   :  { %v2023_v8 = vpop.f32.mrb[12].mxu1 }
0x11c9   :  { %v3669_v12 = vadd.f32 %v4518_v7, %v2023_v8  ;;  %v3430_v22 = vpop.f32.mrb[13].mxu1 }
0x11cb   :  { %3840 = vtanh.f32 %v3669_v12  ;;  %v3080_v29 = vmul.f32 -1.442695, %v3669_v12 }
0x11cc   :  { %3842 = vpow2.f32 %v3082_v28 }
0x11cd   :  { %3844 = vpow2.f32 %v3083_v52 }
0x11ce   :  { %3846 = vpow2.f32 %v3080_v29 }
0x11cf   :  { %v3837_v23 = vpop.eup %3836 }
0x11d0   :  { %v3839_v26 = vpop.eup %3838  ;;  %2153 = vrot.lane.b32.xlu0 %v3837_v23, %s3996_s25 }
0x11d1   :  { %2155 = vrot.lane.b32.xlu1 %v3839_v26, %s3996_s25 }
0x11d5   :  { %v3841_v27 = vpop.eup %3840 }
0x11d6   :  { %2037 = vrot.lane.b32.xlu0 %v3841_v27, %s3996_s25  ;;  %v3843_v32 = vpop.eup %3842 }
0x11d7   :  { %v3845_v33 = vpop.eup %3844  ;;  %v2135_v14 = vadd.f32 1.0, %v3843_v32 }
0x11d8   :  { %v2136_v17 = vadd.f32 1.0, %v3845_v33  ;;  %v3847_v35 = vpop.eup %3846 }
0x11d9   :  { %3848 = vrcp.f32 %v2135_v14  ;;  %v2031_v36 = vadd.f32 1.0, %v3847_v35 }
0x11da   :  { %3850 = vrcp.f32 %v2136_v17 }
0x11db   :  { %3852 = vrcp.f32 %v2031_v36 }
0x11e3   :  { %v3849_v37 = vpop.eup %3848 }
0x11e4   :  { %v3851_v24 = vpop.eup %3850  ;;  %v2149_v54 = vmul.f32 %v3849_v37, %v2145_v45 }
0x11e5   :  { %v3853_v51 = vpop.eup %3852  ;;  %v2150_v55 = vmul.f32 %v3851_v24, %v2146_v53 }
0x11e6   :  { %v2035_v50 = vmul.f32 %v3853_v51, %v4472_v41 }
0x1242   :  { %v2154_v43 = vpop.permute.xlu0 %2153 }
0x1243   :  { %v2156_v25 = vpop.permute.xlu1 %2155  ;;  %v2159_v44 = vmul.f32 %v3849_v37, %v2154_v43 }
0x1244   :  { %v2160_v42 = vmul.f32 %v3851_v24, %v2156_v25 }
0x1245   :  { %2163 = vrot.lane.b32.xlu1 %v2159_v44, %s3997_s3 }
0x1246   :  { %2165 = vrot.lane.b32.xlu0 %v2160_v42, %s3997_s3 }
0x1248   :  { %v2038_v30 = vpop.permute.xlu0 %2037 }
0x1249   :  { %v2040_v31 = vmul.f32 %v3853_v51, %v2038_v30 }
0x124b   :  { %2042 = vrot.lane.b32.xlu1 %v2040_v31, %s3997_s3 }
0x12b7   :  { %v2164_v58 = vpop.permute.xlu1 %2163 }
0x12b8   :  { %v2166_v38 = vpop.permute.xlu0 %2165  ;;  %v4529_v34 = vadd.f32 %v2164_v58, %v2149_v54 }
0x12b9   :  { %v4531_v40 = vadd.f32 %v2166_v38, %v2150_v55 }
0x12ba   :  { %3854 = vtanh.f32 %v4529_v34 }
0x12bb   :  { %3856 = vtanh.f32 %v4531_v40 }
0x12bd   :  { %v2043_v61 = vpop.permute.xlu1 %2042 }
0x12be   :  { %v4536_v62 = vadd.f32 %v2043_v61, %v2035_v50  ;;  %v2455_v50 = vrot.slane %v4529_v34, 7  ;;  %v2456_v61 = vrot.slane %v4531_v40, 7 }
0x12c0   :  { %3858 = vtanh.f32 %v4536_v62 }
0x12c4   :  { %v3855_v21 = vpop.eup %3854 }
0x12c5   :  { %v3857_v47 = vpop.eup %3856  ;;  %2175 = vrot.lane.b32.xlu0 %v3855_v21, %s3996_s25 }
0x12c6   :  { %2177 = vrot.lane.b32.xlu1 %v3857_v47, %s3996_s25 }
0x12ca   :  { %v3859_v2 = vpop.eup %3858 }
0x12cb   :  { %2048 = vrot.lane.b32.xlu0 %v3859_v2, %s3996_s25 }
0x1337   :  { %v2176_v4 = vpop.permute.xlu0 %2175 }
0x1338   :  { %v2178_v5 = vpop.permute.xlu1 %2177  ;;  %v2181_v6 = vmul.f32 %v3849_v37, %v2176_v4 }
0x1339   :  { %v2182_v9 = vmul.f32 %v3851_v24, %v2178_v5 }
0x133a   :  { %v2185_v15 = vrot.slane %v2181_v6, 6 }
0x133b   :  { %v2186_v41 = vrot.slane %v2182_v9, 5 }
0x133d   :  { %v2187_v56 = vsel %vm333_vm2, %v2186_v41, %v2185_v15  ;;  %v2049_v57 = vpop.permute.xlu0 %2048 }
0x133e   :  { %2188 = vrot.lane.b32.xlu1 %v2187_v56, %s3997_s3  ;;  %v2051_v18 = vmul.f32 %v3853_v51, %v2049_v57 }
0x1340   :  { %v2790_v19 = vrot.slane %v2051_v18, %v4295_v3  ;;  %2263 = vrot.lane.b32.xlu0 %v2051_v18, %s3997_s3 }
0x1342   :  { %v2791_v49 = vcombine.high %v2790_v19, %v2790_v19  ;;  %v2798_v39 = vrot.slane %v2790_v19, %v4295_v3 }
0x1344   :  { %v2805_v60 = vrot.slane %v2791_v49, %v4295_v3  ;;  %v2894_v8 = vrot.slane %v2798_v39, %v4301_v13 }
0x1346   :  { %v2898_v12 = vrot.slane %v2805_v60, %v4301_v13  ;;  %v4551_v22 = vsel %vm2933_vm8, %v4487_v10, %v2894_v8 }
0x1348   :  { %v4554_v23 = vsel %vm2933_vm8, %v4490_v11, %v2898_v12 }
0x13b0   :  { %v2189_v26 = vpop.permute.xlu1 %2188 }
0x13b1   :  { %3451 = vmatmul.mubr.msk.f32.vlgmr.msra.gmra.mrb[14].mxu0 %vm196_vm3, %v2189_v26  ;;  %3473 = vmatmul.mubr.msk.f32.vlgmr.msra.gmra.mrb[14].mxu1 %vm196_vm3, %v2189_v26 }
0x13b2   :  { %3634 = vmatpush3.bf16.msra.mxu0 %v4191_v59  ;;  %3461 = vmatprep.mubr.msk.f32.mxu0 %vm3994_vm0, %v3995_v1  ;;  %v2264_v10 = vpop.permute.xlu0 %2263 }
0x13b3   :  { %3635 = vmatprep.subr.bf16.mxu0 %v3993_v0  ;;  %3646 = vmatpush3.bf16.msra.mxu1 %v4176_v46 }
0x13b4   :  { %3647 = vmatprep.subr.bf16.mxu1 %v3993_v0  ;;  %3483 = vmatprep.mubr.msk.f32.mxu1 %vm3994_vm0, %v3995_v1 }
0x13b6   :  { %3637 = vmatpush3.bf16.msra.mxu0 %v4196_v63 }
0x13b7   :  { %3649 = vmatpush3.bf16.msra.mxu1 %v4182_v48 }
0x13b8   :  { %3650 = vmatprep.subr.bf16.mxu1 %v3993_v0 }
0x13b9   :  { %3462 = vmatmul.mubr.msk.f32.vlgmr.msra.gmra.mrb[14].mxu0 %vm196_vm3, %v2264_v10 }
0x1484   :  { %v2428_v11 = vpop.f32.mrb[14].mxu1 }
0x1485   :  { %v2433_v27 = vrot.slane %v2428_v11, 1  ;;  %v2434_v28 = vrot.slane %v2428_v11, 2  ;;  %v3474_v52 = vpop.f32.mrb[15].mxu1 }
0x1487   :  { %v2437_v46 = vadd.f32 %v2433_v27, %v4153_v20  ;;  %v2438_v29 = vadd.f32 %v2434_v28, %v4151_v16 }
0x1489   :  { %3860 = vtanh.f32 %v2437_v46  ;;  %v3088_v36 = vmul.f32 -1.442695, %v2437_v46  ;;  %v3089_v20 = vmul.f32 -1.442695, %v2438_v29 }
0x148a   :  { %3862 = vtanh.f32 %v2438_v29 }
0x148c   :  { %v2333_v32 = vpop.f32.mrb[14].mxu0 }
0x148d   :  { %v3670_v33 = vadd.f32 %v4518_v7, %v2333_v32  ;;  %v3463_v14 = vpop.f32.mrb[15].mxu0 }
0x148f   :  { %3864 = vtanh.f32 %v3670_v33  ;;  %v3086_v16 = vmul.f32 -1.442695, %v3670_v33 }
0x1490   :  { %3866 = vpow2.f32 %v3088_v36 }
0x1491   :  { %3868 = vpow2.f32 %v3089_v20 }
0x1492   :  { %3870 = vpow2.f32 %v3086_v16 }
0x1493   :  { %v3861_v48 = vpop.eup %3860 }
0x1494   :  { %v3863_v17 = vpop.eup %3862  ;;  %2463 = vrot.lane.b32.xlu1 %v3861_v48, %s3996_s25 }
0x1495   :  { %2465 = vrot.lane.b32.xlu0 %v3863_v17, %s3996_s25 }
0x1499   :  { %v3865_v35 = vpop.eup %3864 }
0x149a   :  { %2347 = vrot.lane.b32.xlu1 %v3865_v35, %s3996_s25  ;;  %v3867_v37 = vpop.eup %3866 }
0x149b   :  { %v3869_v43 = vpop.eup %3868  ;;  %v2445_v24 = vadd.f32 1.0, %v3867_v37  ;;  %v102_v37 = vld [vmem:[%s4640_s7 + $0x8] sm:$0xff] }
0x149c   :  { %v2446_v25 = vadd.f32 1.0, %v3869_v43  ;;  %v3871_v44 = vpop.eup %3870  ;;  %v103_v43 = vld [vmem:[%s4640_s7 + $0x10] sm:$0xff] }
0x149d   :  { %3872 = vrcp.f32 %v2445_v24  ;;  %v2341_v42 = vadd.f32 1.0, %v3871_v44  ;;  %v104_v44 = vld [vmem:[%s4640_s7 + $0x18] sm:$0xff] }
0x149e   :  { %3874 = vrcp.f32 %v2446_v25 }
0x149f   :  { %3876 = vrcp.f32 %v2341_v42  ;;  %v3660_v42 = vpack.c.bf16 %v104_v44, %v103_v43 }
0x14a7   :  { %v3873_v51 = vpop.eup %3872 }
0x14a8   :  { %v3875_v31 = vpop.eup %3874  ;;  %v2459_v21 = vmul.f32 %v3873_v51, %v2455_v50 }
0x14a9   :  { %v3877_v55 = vpop.eup %3876  ;;  %v2460_v2 = vmul.f32 %v3875_v31, %v2456_v61 }
0x14aa   :  { %v2345_v9 = vmul.f32 %v3877_v55, %v4536_v62 }
0x1506   :  { %v2464_v30 = vpop.permute.xlu1 %2463 }
0x1507   :  { %v2469_v45 = vmul.f32 %v3873_v51, %v2464_v30  ;;  %v2466_v53 = vpop.permute.xlu0 %2465 }
0x1508   :  { %v2470_v54 = vmul.f32 %v3875_v31, %v2466_v53 }
0x1509   :  { %2473 = vrot.lane.b32.xlu0 %v2469_v45, %s3997_s3 }
0x150a   :  { %2475 = vrot.lane.b32.xlu1 %v2470_v54, %s3997_s3 }
0x150c   :  { %v2348_v58 = vpop.permute.xlu1 %2347 }
0x150d   :  { %v2350_v38 = vmul.f32 %v3877_v55, %v2348_v58 }
0x150f   :  { %2352 = vrot.lane.b32.xlu0 %v2350_v38, %s3997_s3 }
0x157b   :  { %v2474_v47 = vpop.permute.xlu0 %2473 }
0x157c   :  { %v2479_v4 = vadd.f32 %v2474_v47, %v2459_v21  ;;  %v2476_v5 = vpop.permute.xlu1 %2475  ;;  %v3093_v47 = vld [vmem:[#allocation7] ss:$0 sm:$0xff] }
0x157d   :  { %v2480_v6 = vadd.f32 %v2476_v5, %v2460_v2 }
0x157e   :  { %3878 = vtanh.f32 %v2479_v4 }
0x157f   :  { %3880 = vtanh.f32 %v2480_v6 }
0x1581   :  { %v2353_v15 = vpop.permute.xlu0 %2352 }
0x1582   :  { %v2355_v41 = vadd.f32 %v2353_v15, %v2345_v9 }
0x1584   :  { %3882 = vtanh.f32 %v2355_v41 }
0x1588   :  { %v3879_v56 = vpop.eup %3878 }
0x1589   :  { %v3881_v57 = vpop.eup %3880  ;;  %2485 = vrot.lane.b32.xlu1 %v3879_v56, %s3996_s25 }
0x158a   :  { %2487 = vrot.lane.b32.xlu0 %v3881_v57, %s3996_s25 }
0x158e   :  { %v3883_v34 = vpop.eup %3882 }
0x158f   :  { %2358 = vrot.lane.b32.xlu1 %v3883_v34, %s3996_s25 }
0x15fb   :  { %v2486_v40 = vpop.permute.xlu1 %2485 }
0x15fc   :  { %v2491_v18 = vmul.f32 %v3873_v51, %v2486_v40  ;;  %v2488_v19 = vpop.permute.xlu0 %2487 }
0x15fd   :  { %v2492_v49 = vmul.f32 %v3875_v31, %v2488_v19 }
0x15fe   :  { %v2495_v39 = vrot.slane %v2491_v18, 7 }
0x15ff   :  { %v2496_v60 = vrot.slane %v2492_v49, 6 }
0x1601   :  { %v2497_v62 = vsel %vm333_vm2, %v2496_v60, %v2495_v39  ;;  %v2359_v8 = vpop.permute.xlu1 %2358 }
0x1602   :  { %2498 = vrot.lane.b32.xlu0 %v2497_v62, %s3997_s3  ;;  %v2361_v12 = vmul.f32 %v3877_v55, %v2359_v8 }
0x1604   :  { %v2812_v26 = vrot.slane %v2361_v12, %v4295_v3  ;;  %2573 = vrot.lane.b32.xlu1 %v2361_v12, %s3997_s3 }
0x1606   :  { %v2813_v10 = vcombine.high %v2812_v26, %v2812_v26  ;;  %v2820_v11 = vrot.slane %v2812_v26, %v4295_v3 }
0x1608   :  { %v2827_v27 = vrot.slane %v2813_v10, %v4295_v3  ;;  %v2904_v28 = vrot.slane %v2820_v11, %v4301_v13 }
0x160a   :  { %v2937_v52 = vsel %vm2936_vm9, %v4551_v22, %v2904_v28  ;;  %v2908_v46 = vrot.slane %v2827_v27, %v4301_v13 }
0x160c   :  { %v2938_v29 = vsel %vm2936_vm9, %v4554_v23, %v2908_v46 }
0x1674   :  { %v2499_v32 = vpop.permute.xlu0 %2498 }
0x1675   :  { %3484 = vmatmul.mubr.msk.f32.vlgmr.msra.gmra.mrb[16].mxu1 %vm196_vm3, %v2499_v32 }
0x1676   :  { %3652 = vmatpush3.bf16.msra.mxu1 %v4191_v59  ;;  %3494 = vmatprep.mubr.msk.f32.mxu1 %vm3994_vm0, %v3995_v1  ;;  %v2574_v33 = vpop.permute.xlu1 %2573 }
0x1677   :  { %3653 = vmatprep.subr.bf16.mxu1 %v3993_v0 }
0x167a   :  { %3655 = vmatpush3.bf16.msra.mxu1 %v4196_v63 }
0x167d   :  { %3495 = vmatmul.mubr.msk.f32.vlgmr.msra.gmra.mrb[16].mxu1 %vm196_vm3, %v2574_v33 }
0x1750   :  { %v2643_v22 = vpop.f32.mrb[16].mxu1 }
0x1751   :  { %v3671_v14 = vadd.f32 %v4518_v7, %v2643_v22  ;;  %v3496_v48 = vpop.f32.mrb[17].mxu1  ;;  %v101_v7 = vld [vmem:[%s4640_s7] sm:$0xff] }
0x1752   :  { %v3656_v25 = vpack.c.bf16 %v102_v37, %v101_v7 }
0x1753   :  { %3884 = vtanh.f32 %v3671_v14  ;;  %v3092_v17 = vmul.f32 -1.442695, %v3671_v14 }
0x1754   :  { %3657 = vmatprep.subr.bf16.mxu0 %v3656_v25 }
0x1755   :  { %3886 = vpow2.f32 %v3092_v17  ;;  %3659 = vmatpush3.bf16.msra.mxu0 %v3656_v25 }
0x1756   :  { %3661 = vmatprep.subr.bf16.mxu0 %v3660_v42 }
0x1759   :  { %3663 = vmatpush3.bf16.msra.mxu0 %v3660_v42 }
0x175d   :  { %v3885_v23 = vpop.eup %3884 }
0x175e   :  { %2657 = vrot.lane.b32.xlu0 %v3885_v23, %s3996_s25 }
0x175f   :  { %v3887_v59 = vpop.eup %3886 }
0x1760   :  { %v2651_v35 = vadd.f32 1.0, %v3887_v59 }
0x1762   :  { %3888 = vrcp.f32 %v2651_v35 }
0x176c   :  { %v3889_v1 = vpop.eup %3888 }
0x176d   :  { %v2655_v63 = vmul.f32 %v3889_v1, %v2355_v41 }
0x17d0   :  { %v2658_v0 = vpop.permute.xlu0 %2657 }
0x17d1   :  { %v2660_v36 = vmul.f32 %v3889_v1, %v2658_v0 }
0x17d3   :  { %2662 = vrot.lane.b32.xlu1 %v2660_v36, %s3997_s3 }
0x1845   :  { %v2663_v20 = vpop.permute.xlu1 %2662 }
0x1846   :  { %v2665_v16 = vadd.f32 %v2663_v20, %v2655_v63 }
0x1848   :  { %3890 = vtanh.f32 %v2665_v16 }
0x1852   :  { %v3891_v24 = vpop.eup %3890 }
0x1853   :  { %2668 = vrot.lane.b32.xlu0 %v3891_v24, %s3996_s25 }
0x18c5   :  { %v2669_v51 = vpop.permute.xlu0 %2668 }
0x18c6   :  { %v2671_v30 = vmul.f32 %v3889_v1, %v2669_v51 }
0x18c8   :  { %v2835_v31 = vrot.slane %v2671_v30, %v4295_v3 }
0x18ca   :  { %v2836_v45 = vcombine.high %v2835_v31, %v2835_v31  ;;  %v2843_v53 = vrot.slane %v2835_v31, %v4295_v3 }
0x18cc   :  { %v2850_v54 = vrot.slane %v2836_v45, %v4295_v3  ;;  %v2914_v55 = vrot.slane %v2843_v53, %v4301_v13 }
0x18ce   :  { %v2940_v58 = vsel %vm2939_vm10, %v2937_v52, %v2914_v55  ;;  %v2918_v38 = vrot.slane %v2850_v54, %v4301_v13 }
0x18cf   :  { %2950 = vrot.lane.b32.xlu1 %v2940_v58, %s3997_s3 }
0x18d0   :  { %v2941_v50 = vsel %vm2939_vm10, %v2938_v29, %v2918_v38 }
0x18d1   :  { %2952 = vrot.lane.b32.xlu0 %v2941_v50, %s3997_s3 }
0x1941   :  { %v2951_v61 = vpop.permute.xlu1 %2950 }
0x1942   :  { %3505 = vmatprep.mubr.msk.f32.mxu0 %vm196_vm3, %v2951_v61 }
0x1943   :  { %v2953_v21 = vpop.permute.xlu0 %2952 }
0x1944   :  { %3506 = vmatmul.mubr.msk.f32.vlgmr.msra.gmra.mrb[16].mxu0 %vm196_vm3, %v2953_v21 }
0x1a17   :  { %v3507_v2 = vpop.f32.mrb[16].mxu0 }
0x1a18   :  { %v3030_v3 = vadd.f32 %v3507_v2, %v3093_v47  ;;  %v3024_v4 = vpop.f32.mrb[17].mxu0 }
0x1a19   :  { %v3025_v5 = vadd.f32 %v3093_v47, %v3024_v4 }
0x1a1a   :  { %3035 = vst.msk [vmem:[%s4642_s9 + $0x8] sm:$0xff] %vm3033_vm11, %v3030_v3 }
0x1a1b   :  { %3034 = vst.msk [vmem:[%s4642_s9] sm:$0xff] %vm3033_vm11, %v3025_v5 }
0x1a1c   :  { %3040 = vsyncpa [#allocation3], 1 }
0x1a1d   :  { %3041 = vsyncpa [#allocation5], 1 }
0x1a1e   :  { %3042 = vsyncpa [#allocation8], 1 }

</bundles_post_ra>
